<compile_context>
chip_gen: v7x
topology: tpu7x:2x2x1
jax: 0.10.0
libtpu: 0.0.40
codegen_flags: <defaults>
</compile_context>

<pallas_src>
import functools

import jax
import jax.numpy as jnp
from jax.experimental import pallas as pl
from jax.experimental.pallas import tpu as pltpu


def _round_up(n, m):
    return ((n + m - 1) // m) * m


def _pad_axis(a, axis, target):
    pad = target - a.shape[axis]
    if pad == 0:
        return a
    widths = [(0, 0)] * a.ndim
    widths[axis] = (0, pad)
    return jnp.pad(a, widths)


def network_kernel(x_ref, ct2s_ref, sig2_ref, bias_ref, w0_ref, b0_ref,
                   w1_ref, b1_ref, kt_ref, rhat_ref, ehat_ref, *, c_chunk):
    x = x_ref[...]                                   # (TN, D)  f32

    # --- RBF layer (all centre-side work pre-folded in the wrapper) --------
    #   exponent = -sigma^2*||x - c||^2
    #            = x @ (2*sigma^2*c^T)  -  sigma^2*||x||^2  -  sigma^2*||c||^2
    x2 = jnp.sum(x * x, axis=-1, keepdims=True)                      # (TN, 1)
    xc2s = jnp.dot(x, ct2s_ref[...], preferred_element_type=jnp.float32)
    expo = jnp.minimum(xc2s - sig2_ref[...] * x2 + bias_ref[...], 0.0)
    phi = jnp.exp(expo)                                              # (TN, O)

    # --- Linear0 + relu  (bf16 operands, f32 MXU accumulation) -------------
    h = jnp.dot(phi.astype(jnp.bfloat16), w0_ref[...],
                preferred_element_type=jnp.float32) + b0_ref[...]
    h = jnp.maximum(h, 0.0)                                          # (TN, Cp)
    h_bf = h.astype(jnp.bfloat16)

    # --- Linear1 + exp + first kern product, chunked along Cp --------------
    # Chunking lets the EUP exp of one 512-wide chunk overlap the MXU stream
    # of the next chunk (MXU -> EUP -> MXU dependency broken at chunk
    # granularity).  ehat1 accumulates in f32.
    cp = w1_ref.shape[1]
    kp = kt_ref.shape[1]
    tn = x_ref.shape[0]
    ehat1 = jnp.zeros((tn, kp), jnp.float32)
    for c0 in range(0, cp, c_chunk):
        out_c = jnp.exp(
            jnp.dot(h_bf, w1_ref[:, c0:c0 + c_chunk],
                    preferred_element_type=jnp.float32)
            + b1_ref[:, c0:c0 + c_chunk])                            # (TN, chunk)
        ehat1 = ehat1 + jnp.dot(out_c.astype(jnp.bfloat16),
                                kt_ref[c0:c0 + c_chunk, :],
                                preferred_element_type=jnp.float32)  # (TN, Kp)
        rhat_ref[:, c0:c0 + c_chunk] = out_c      # unscaled; rescaled below

    # --- fold the second kern matmul into a per-row scale ------------------
    # corr = ehat1[:, 0] is a per-row scalar, so
    #   (out / corr) @ kern^T == (out @ kern^T) / corr.
    # Exact reciprocal: a (TN, 1) divide is negligible and keeps ehat[:,0]==1.
    inv_corr = 1.0 / ehat1[:, 0:1]
    rhat_ref[...] = rhat_ref[...] * inv_corr
    ehat_ref[...] = ehat1 * inv_corr


def network_forward(x, centres, sigmas, w0, b0, w1, b1, kern, *,
                    tn=256, c_chunk=None):
    """Pallas forward of Network.

    Args follow the PyTorch module, with Linear weights pre-transposed:
      x (N, D), centres (O, D), sigmas (O,),
      w0 (O, C), b0 (C,), w1 (C, C), b1 (C,), kern (K, C).
    Returns (Rhat (N, C), Ehat (N, K)).
    """
    N, D = x.shape
    O = centres.shape[0]
    C = w0.shape[1]
    K = kern.shape[0]

    # Lane-pad the big feature dims to multiples of 128 (dense unmasked
    # stores); pad N up to a multiple of the batch tile.
    Cp = _round_up(C, 128)
    Kp = _round_up(K, 128)
    tn = max(8, min(_round_up(tn, 8), _round_up(N, 8)))
    Np = _round_up(N, tn)

    # Chunk width for the Linear1/exp/kern loop: 512 at real (C=2000) scale,
    # otherwise the full (already small) padded width.
    if c_chunk is None:
        c_chunk = 512 if Cp % 512 == 0 else Cp
    else:
        c_chunk = _round_up(c_chunk, 128)
        if Cp % c_chunk != 0:
            c_chunk = Cp

    xp = _pad_axis(x.astype(jnp.float32), 0, Np)

    # RBF prep hoisted out of the kernel (no per-step XLU transpose / reduce).
    c_f32 = centres.astype(jnp.float32)
    sig2 = (sigmas.astype(jnp.float32) ** 2).reshape(1, O)          # (1, O)
    ct2s = (2.0 * sig2) * c_f32.T                                   # (D, O)
    rbf_bias = -sig2 * jnp.sum(c_f32 * c_f32, axis=-1).reshape(1, O)

    # Zero-padding is exact for the outputs we keep: padded h columns are 0,
    # padded `out` columns are exp(0)=1 but hit zero rows of kern^T, padded
    # kern columns give zero ehat lanes, and everything is sliced back below.
    w0p = _pad_axis(w0, 1, Cp).astype(jnp.bfloat16)                       # (O, Cp)
    b0p = _pad_axis(b0.reshape(1, C).astype(jnp.float32), 1, Cp)          # (1, Cp)
    w1p = _pad_axis(_pad_axis(w1, 0, Cp), 1, Cp).astype(jnp.bfloat16)     # (Cp, Cp)
    b1p = _pad_axis(b1.reshape(1, C).astype(jnp.float32), 1, Cp)          # (1, Cp)
    kt = _pad_axis(_pad_axis(kern.T, 0, Cp), 1, Kp).astype(jnp.bfloat16)  # (Cp, Kp)

    # VMEM budget: single-buffered resident weights + double-buffered tiles +
    # in-kernel f32 intermediates, with headroom.  Cap at 75% of this chip's
    # physical VMEM (v5e/v6e: 128 MiB -> 96 MiB cap; v7x: 64 MiB -> 48 MiB).
    w_bytes = 2 * (O * Cp + Cp * Cp + Cp * Kp) + 4 * (D * O + 2 * O + 2 * Cp)
    act_bytes = 4 * tn * (D + O + 3 * Cp + 2 * Kp)
    budget = 2 * w_bytes + 3 * act_bytes + (8 << 20)
    try:
        cap = int(pltpu.get_tpu_info().vmem_capacity_bytes * 3 // 4)
    except Exception:
        cap = 48 << 20
    vmem_limit = int(min(max(budget, 32 << 20), cap))

    operands = (xp, ct2s, sig2, rbf_bias, w0p, b0p, w1p, b1p, kt)

    def build(single_buffer_weights):
        def tiled(shape):
            return pl.BlockSpec(shape, lambda i: (i, 0))

        if single_buffer_weights:
            # Constant index_map => the block never changes; single-buffer it
            # so the (~5 MiB at real scale) bf16 weights are not duplicated.
            def resident(shape):
                return pl.BlockSpec(shape, lambda i: (0, 0),
                                    pipeline_mode=pl.Buffered(1))
        else:
            def resident(shape):
                return pl.BlockSpec(shape, lambda i: (0, 0))

        return pl.pallas_call(
            functools.partial(network_kernel, c_chunk=c_chunk),
            out_shape=(jax.ShapeDtypeStruct((Np, Cp), jnp.float32),
                       jax.ShapeDtypeStruct((Np, Kp), jnp.float32)),
            grid_spec=pltpu.PrefetchScalarGridSpec(
                num_scalar_prefetch=0,
                grid=(Np // tn,),
                in_specs=[tiled((tn, D)),
                          resident((D, O)), resident((1, O)), resident((1, O)),
                          resident((O, Cp)), resident((1, Cp)),
                          resident((Cp, Cp)), resident((1, Cp)),
                          resident((Cp, Kp))],
                out_specs=[tiled((tn, Cp)), tiled((tn, Kp))],
            ),
            # NOTE(v7x): verify in xprof that the "parallel" batch axis is
            # sharded across both TensorCores; if not, switch to CORE_PARALLEL.
            compiler_params=pltpu.CompilerParams(
                dimension_semantics=("parallel",),
                vmem_limit_bytes=vmem_limit),
        )

    try:
        rhat_p, ehat_p = build(True)(*operands)
        jax.block_until_ready((rhat_p, ehat_p))
    except Exception:
        # Older jax without pipeline_mode / Buffered(1): fall back to default
        # double-buffered weights (correct, just uses a bit more VMEM).
        rhat_p, ehat_p = build(False)(*operands)

    return rhat_p[:N, :C], ehat_p[:N, :K]


def reference_forward(x, centres, sigmas, w0, b0, w1, b1, kern):
    """Pure-JAX mirror of the PyTorch forward (broadcast RBF, explicit second
    kern matmul).  Matmul operands are cast to bf16 with f32 accumulation to
    mirror the kernel's MXU precision choice."""
    def mm(a, b):
        return jnp.dot(a.astype(jnp.bfloat16), b.astype(jnp.bfloat16),
                       preferred_element_type=jnp.float32)

    diff = x[:, None, :] - centres[None, :, :]
    d = jnp.sqrt(jnp.sum(diff * diff, axis=-1)) * sigmas[None, :]
    phi = jnp.exp(-(d * d))                                      # gaussian basis
    h = jnp.maximum(mm(phi, w0) + b0[None, :], 0.0)
    out = jnp.exp(mm(h, w1) + b1[None, :])
    ehat1 = mm(out, kern.T)                                      # (kern @ out.T).T
    rhat = out / ehat1[:, 0:1]
    ehat = mm(rhat, kern.T)
    return rhat, ehat


if __name__ == "__main__":
    # Small stand-in shapes consistent with the module:
    #   layer_widths  = [D, O] = [8, 16]
    #   layer_centres = [C]    = [200]   (stands in for the hard-coded 2000)
    #   kern shape    = (K, C) = (40, 200)  (stands in for (151, 2000))
    N, D, O, C, K = 48, 8, 16, 200, 40

    key = jax.random.PRNGKey(0)
    kx, kc, kw0, kb0, kw1, kb1, kk = jax.random.split(key, 7)

    x = 0.1 * jax.random.normal(kx, (N, D), dtype=jnp.float32)

    # Deterministic parameter init mirroring the PyTorch module's reset logic.
    centres = 0.01 * jax.random.normal(kc, (O, D), dtype=jnp.float32)  # N(0, 0.01)
    sigmas = jnp.full((O,), 2.0, dtype=jnp.float32)                    # constant 2

    lim0 = float(O) ** -0.5
    w0 = jax.random.uniform(kw0, (O, C), jnp.float32, -lim0, lim0)     # Linear0 weight.T
    b0 = jax.random.uniform(kb0, (C,), jnp.float32, -lim0, lim0)
    lim1 = float(C) ** -0.5
    w1 = jax.random.uniform(kw1, (C, C), jnp.float32, -lim1, lim1)     # Linear1 weight.T
    b1 = jax.random.uniform(kb1, (C,), jnp.float32, -lim1, lim1)

    # Synthetic positive integration kernel (out = exp(..) > 0 so Ehat[:,0] > 0).
    kern = jax.random.uniform(kk, (K, C), jnp.float32, 0.01, 0.1)

    # Small tn / c_chunk here only to exercise the multi-step grid and the
    # multi-chunk Linear1 loop at toy scale; production defaults are 256 / 512.
    rhat, ehat = network_forward(x, centres, sigmas, w0, b0, w1, b1, kern,
                                 tn=16, c_chunk=128)
    jax.block_until_ready((rhat, ehat))

    rhat_ref, ehat_ref = reference_forward(x, centres, sigmas, w0, b0, w1, b1, kern)
    assert rhat.shape == (N, C) and ehat.shape == (N, K)
    # Tolerance covers the bf16 MXU rounding and the algebraically-exact
    # rewrites (folded second matmul, expanded-form RBF distance).
    assert jnp.allclose(rhat, rhat_ref, rtol=2e-2, atol=2e-3), \
        float(jnp.max(jnp.abs(rhat - rhat_ref)))
    assert jnp.allclose(ehat, ehat_ref, rtol=2e-2, atol=2e-3), \
        float(jnp.max(jnp.abs(ehat - ehat_ref)))

    print("KERNEL_OK")
</pallas_src>

<mosaic_0001>
module attributes {stable_mosaic.version = 11 : i64} {
  func.func @network_kernel(%arg0: i32, %arg1: memref<16x8xf32, #tpu.memory_space<vmem>>, %arg2: memref<8x16xf32, #tpu.memory_space<vmem>>, %arg3: memref<1x16xf32, #tpu.memory_space<vmem>>, %arg4: memref<1x16xf32, #tpu.memory_space<vmem>>, %arg5: memref<16x256xbf16, #tpu.memory_space<vmem>>, %arg6: memref<1x256xf32, #tpu.memory_space<vmem>>, %arg7: memref<256x256xbf16, #tpu.memory_space<vmem>>, %arg8: memref<1x256xf32, #tpu.memory_space<vmem>>, %arg9: memref<256x128xbf16, #tpu.memory_space<vmem>>, %arg10: memref<16x256xf32, #tpu.memory_space<vmem>>, %arg11: memref<16x128xf32, #tpu.memory_space<vmem>>) attributes {dimension_semantics = [#tpu.dimension_semantics<parallel>], iteration_bounds = array<i64: 3>, scalar_prefetch = 0 : i64, scratch_operands = 0 : i64, tpu.core_type = #tpu.core_type<tc>, window_params = [{transform_indices = @transform_0, window_bounds = array<i64: 16, 8>}, {pipeline_mode = #tpu.pipeline_mode<synchronous>, transform_indices = @transform_1, window_bounds = array<i64: 8, 16>}, {pipeline_mode = #tpu.pipeline_mode<synchronous>, transform_indices = @transform_2, window_bounds = array<i64: 1, 16>}, {pipeline_mode = #tpu.pipeline_mode<synchronous>, transform_indices = @transform_3, window_bounds = array<i64: 1, 16>}, {pipeline_mode = #tpu.pipeline_mode<synchronous>, transform_indices = @transform_4, window_bounds = array<i64: 16, 256>}, {pipeline_mode = #tpu.pipeline_mode<synchronous>, transform_indices = @transform_5, window_bounds = array<i64: 1, 256>}, {pipeline_mode = #tpu.pipeline_mode<synchronous>, transform_indices = @transform_6, window_bounds = array<i64: 256, 256>}, {pipeline_mode = #tpu.pipeline_mode<synchronous>, transform_indices = @transform_7, window_bounds = array<i64: 1, 256>}, {pipeline_mode = #tpu.pipeline_mode<synchronous>, transform_indices = @transform_8, window_bounds = array<i64: 256, 128>}, {transform_indices = @transform_9, window_bounds = array<i64: 16, 256>}, {transform_indices = @transform_10, window_bounds = array<i64: 16, 128>}]} {
    %c0 = arith.constant 0 : index
    %c0_0 = arith.constant 0 : index
    %0 = vector.load %arg1[%c0, %c0_0] : memref<16x8xf32, #tpu.memory_space<vmem>>, vector<16x8xf32>
    %1 = arith.mulf %0, %0 : vector<16x8xf32>
    %cst = arith.constant dense<0.000000e+00> : vector<16xf32>
    %2 = vector.multi_reduction <add>, %1, %cst [1] : vector<16x8xf32> to vector<16xf32>
    %3 = vector.shape_cast %2 : vector<16xf32> to vector<16x1xf32>
    %c0_1 = arith.constant 0 : index
    %c0_2 = arith.constant 0 : index
    %4 = vector.load %arg2[%c0_1, %c0_2] : memref<8x16xf32, #tpu.memory_space<vmem>>, vector<8x16xf32>
    %cst_3 = arith.constant dense<0.000000e+00> : vector<16x16xf32>
    %5 = tpu.matmul %0, %4, %cst_3 {dimension_numbers = #tpu.dot_dimension_numbers<[1], [0], [0], [1], [0, 0, 1, 1], [], []>} : vector<16x8xf32>, vector<8x16xf32>, vector<16x16xf32> -> vector<16x16xf32>
    %c0_4 = arith.constant 0 : index
    %c0_5 = arith.constant 0 : index
    %6 = vector.load %arg3[%c0_4, %c0_5] : memref<1x16xf32, #tpu.memory_space<vmem>>, vector<1x16xf32>
    %7 = vector.broadcast %6 : vector<1x16xf32> to vector<16x16xf32>
    %8 = vector.broadcast %3 : vector<16x1xf32> to vector<16x16xf32>
    %9 = arith.mulf %7, %8 : vector<16x16xf32>
    %10 = arith.subf %5, %9 : vector<16x16xf32>
    %c0_6 = arith.constant 0 : index
    %c0_7 = arith.constant 0 : index
    %11 = vector.load %arg4[%c0_6, %c0_7] : memref<1x16xf32, #tpu.memory_space<vmem>>, vector<1x16xf32>
    %12 = vector.broadcast %11 : vector<1x16xf32> to vector<16x16xf32>
    %13 = arith.addf %10, %12 : vector<16x16xf32>
    %cst_8 = arith.constant 0.000000e+00 : f32
    %14 = vector.broadcast %cst_8 : f32 to vector<16x16xf32>
    %15 = arith.minimumf %13, %14 : vector<16x16xf32>
    %16 = math.exp %15 : vector<16x16xf32>
    %17 = arith.truncf %16 : vector<16x16xf32> to vector<16x16xbf16>
    %c0_9 = arith.constant 0 : index
    %c0_10 = arith.constant 0 : index
    %18 = vector.load %arg5[%c0_9, %c0_10] : memref<16x256xbf16, #tpu.memory_space<vmem>>, vector<16x256xbf16>
    %cst_11 = arith.constant dense<0.000000e+00> : vector<16x256xf32>
    %19 = tpu.matmul %17, %18, %cst_11 {dimension_numbers = #tpu.dot_dimension_numbers<[1], [0], [0], [1], [0, 0, 1, 1], [], []>} : vector<16x16xbf16>, vector<16x256xbf16>, vector<16x256xf32> -> vector<16x256xf32>
    %c0_12 = arith.constant 0 : index
    %c0_13 = arith.constant 0 : index
    %20 = vector.load %arg6[%c0_12, %c0_13] : memref<1x256xf32, #tpu.memory_space<vmem>>, vector<1x256xf32>
    %21 = vector.broadcast %20 : vector<1x256xf32> to vector<16x256xf32>
    %22 = arith.addf %19, %21 : vector<16x256xf32>
    %cst_14 = arith.constant 0.000000e+00 : f32
    %23 = vector.broadcast %cst_14 : f32 to vector<16x256xf32>
    %24 = arith.maximumf %22, %23 : vector<16x256xf32>
    %25 = arith.truncf %24 : vector<16x256xf32> to vector<16x256xbf16>
    %cst_15 = arith.constant 0.000000e+00 : f32
    %26 = vector.broadcast %cst_15 : f32 to vector<16x128xf32>
    %c0_16 = arith.constant 0 : index
    %c0_17 = arith.constant 0 : index
    %27 = vector.load %arg7[%c0_16, %c0_17] : memref<256x256xbf16, #tpu.memory_space<vmem>>, vector<256x128xbf16>
    %cst_18 = arith.constant dense<0.000000e+00> : vector<16x128xf32>
    %28 = tpu.matmul %25, %27, %cst_18 {dimension_numbers = #tpu.dot_dimension_numbers<[1], [0], [0], [1], [0, 0, 1, 1], [], []>} : vector<16x256xbf16>, vector<256x128xbf16>, vector<16x128xf32> -> vector<16x128xf32>
    %c0_19 = arith.constant 0 : index
    %c0_20 = arith.constant 0 : index
    %29 = vector.load %arg8[%c0_19, %c0_20] : memref<1x256xf32, #tpu.memory_space<vmem>>, vector<1x128xf32>
    %30 = vector.broadcast %29 : vector<1x128xf32> to vector<16x128xf32>
    %31 = arith.addf %28, %30 : vector<16x128xf32>
    %32 = math.exp %31 : vector<16x128xf32>
    %33 = arith.truncf %32 : vector<16x128xf32> to vector<16x128xbf16>
    %c0_21 = arith.constant 0 : index
    %c0_22 = arith.constant 0 : index
    %34 = vector.load %arg9[%c0_21, %c0_22] : memref<256x128xbf16, #tpu.memory_space<vmem>>, vector<128x128xbf16>
    %cst_23 = arith.constant dense<0.000000e+00> : vector<16x128xf32>
    %35 = tpu.matmul %33, %34, %cst_23 {dimension_numbers = #tpu.dot_dimension_numbers<[1], [0], [0], [1], [0, 0, 1, 1], [], []>} : vector<16x128xbf16>, vector<128x128xbf16>, vector<16x128xf32> -> vector<16x128xf32>
    %36 = arith.addf %26, %35 : vector<16x128xf32>
    %c0_24 = arith.constant 0 : index
    %c0_25 = arith.constant 0 : index
    %37 = vector.load %arg10[%c0_24, %c0_25] : memref<16x256xf32, #tpu.memory_space<vmem>>, vector<16x128xf32>
    tpu.vector_store %arg10[%c0_24, %c0_25], %32 {strides = array<i32>} : memref<16x256xf32, #tpu.memory_space<vmem>>, vector<16x128xf32>,
    %c0_26 = arith.constant 0 : index
    %c128 = arith.constant 128 : index
    %38 = vector.load %arg7[%c0_26, %c128] : memref<256x256xbf16, #tpu.memory_space<vmem>>, vector<256x128xbf16>
    %cst_27 = arith.constant dense<0.000000e+00> : vector<16x128xf32>
    %39 = tpu.matmul %25, %38, %cst_27 {dimension_numbers = #tpu.dot_dimension_numbers<[1], [0], [0], [1], [0, 0, 1, 1], [], []>} : vector<16x256xbf16>, vector<256x128xbf16>, vector<16x128xf32> -> vector<16x128xf32>
    %c0_28 = arith.constant 0 : index
    %c128_29 = arith.constant 128 : index
    %40 = vector.load %arg8[%c0_28, %c128_29] : memref<1x256xf32, #tpu.memory_space<vmem>>, vector<1x128xf32>
    %41 = vector.broadcast %40 : vector<1x128xf32> to vector<16x128xf32>
    %42 = arith.addf %39, %41 : vector<16x128xf32>
    %43 = math.exp %42 : vector<16x128xf32>
    %44 = arith.truncf %43 : vector<16x128xf32> to vector<16x128xbf16>
    %c128_30 = arith.constant 128 : index
    %c0_31 = arith.constant 0 : index
    %45 = vector.load %arg9[%c128_30, %c0_31] : memref<256x128xbf16, #tpu.memory_space<vmem>>, vector<128x128xbf16>
    %cst_32 = arith.constant dense<0.000000e+00> : vector<16x128xf32>
    %46 = tpu.matmul %44, %45, %cst_32 {dimension_numbers = #tpu.dot_dimension_numbers<[1], [0], [0], [1], [0, 0, 1, 1], [], []>} : vector<16x128xbf16>, vector<128x128xbf16>, vector<16x128xf32> -> vector<16x128xf32>
    %47 = arith.addf %36, %46 : vector<16x128xf32>
    %c0_33 = arith.constant 0 : index
    %c128_34 = arith.constant 128 : index
    %48 = vector.load %arg10[%c0_33, %c128_34] : memref<16x256xf32, #tpu.memory_space<vmem>>, vector<16x128xf32>
    tpu.vector_store %arg10[%c0_33, %c128_34], %43 {strides = array<i32>} : memref<16x256xf32, #tpu.memory_space<vmem>>, vector<16x128xf32>,
    %49 = vector.extract_strided_slice %47 {offsets = [0, 0], sizes = [16, 1], strides = [1, 1]} : vector<16x128xf32> to vector<16x1xf32>
    %cst_35 = arith.constant 1.000000e+00 : f32
    %50 = vector.broadcast %cst_35 : f32 to vector<16x1xf32>
    %51 = arith.divf %50, %49 : vector<16x1xf32>
    %c0_36 = arith.constant 0 : index
    %c0_37 = arith.constant 0 : index
    %52 = vector.load %arg10[%c0_36, %c0_37] : memref<16x256xf32, #tpu.memory_space<vmem>>, vector<16x256xf32>
    %53 = vector.broadcast %51 : vector<16x1xf32> to vector<16x256xf32>
    %54 = arith.mulf %52, %53 : vector<16x256xf32>
    %c0_38 = arith.constant 0 : index
    %c0_39 = arith.constant 0 : index
    %55 = vector.load %arg10[%c0_38, %c0_39] : memref<16x256xf32, #tpu.memory_space<vmem>>, vector<16x256xf32>
    tpu.vector_store %arg10[%c0_38, %c0_39], %54 {strides = array<i32>} : memref<16x256xf32, #tpu.memory_space<vmem>>, vector<16x256xf32>,
    %56 = vector.broadcast %51 : vector<16x1xf32> to vector<16x128xf32>
    %57 = arith.mulf %47, %56 : vector<16x128xf32>
    %c0_40 = arith.constant 0 : index
    %c0_41 = arith.constant 0 : index
    %58 = vector.load %arg11[%c0_40, %c0_41] : memref<16x128xf32, #tpu.memory_space<vmem>>, vector<16x128xf32>
    tpu.vector_store %arg11[%c0_40, %c0_41], %57 {strides = array<i32>} : memref<16x128xf32, #tpu.memory_space<vmem>>, vector<16x128xf32>,
    return
  }
  func.func @transform_0(%arg0: i32) -> (i32, i32) {
    %c0_i32 = arith.constant 0 : i32
    %c0_i32_0 = arith.constant 0 : i32
    return %arg0, %c0_i32 : i32, i32
  }
  func.func @transform_1(%arg0: i32) -> (i32, i32) {
    %c0_i32 = arith.constant 0 : i32
    %c0_i32_0 = arith.constant 0 : i32
    %c0_i32_1 = arith.constant 0 : i32
    return %c0_i32, %c0_i32_0 : i32, i32
  }
  func.func @transform_2(%arg0: i32) -> (i32, i32) {
    %c0_i32 = arith.constant 0 : i32
    %c0_i32_0 = arith.constant 0 : i32
    %c0_i32_1 = arith.constant 0 : i32
    return %c0_i32, %c0_i32_0 : i32, i32
  }
  func.func @transform_3(%arg0: i32) -> (i32, i32) {
    %c0_i32 = arith.constant 0 : i32
    %c0_i32_0 = arith.constant 0 : i32
    %c0_i32_1 = arith.constant 0 : i32
    return %c0_i32, %c0_i32_0 : i32, i32
  }
  func.func @transform_4(%arg0: i32) -> (i32, i32) {
    %c0_i32 = arith.constant 0 : i32
    %c0_i32_0 = arith.constant 0 : i32
    %c0_i32_1 = arith.constant 0 : i32
    return %c0_i32, %c0_i32_0 : i32, i32
  }
  func.func @transform_5(%arg0: i32) -> (i32, i32) {
    %c0_i32 = arith.constant 0 : i32
    %c0_i32_0 = arith.constant 0 : i32
    %c0_i32_1 = arith.constant 0 : i32
    return %c0_i32, %c0_i32_0 : i32, i32
  }
  func.func @transform_6(%arg0: i32) -> (i32, i32) {
    %c0_i32 = arith.constant 0 : i32
    %c0_i32_0 = arith.constant 0 : i32
    %c0_i32_1 = arith.constant 0 : i32
    return %c0_i32, %c0_i32_0 : i32, i32
  }
  func.func @transform_7(%arg0: i32) -> (i32, i32) {
    %c0_i32 = arith.constant 0 : i32
    %c0_i32_0 = arith.constant 0 : i32
    %c0_i32_1 = arith.constant 0 : i32
    return %c0_i32, %c0_i32_0 : i32, i32
  }
  func.func @transform_8(%arg0: i32) -> (i32, i32) {
    %c0_i32 = arith.constant 0 : i32
    %c0_i32_0 = arith.constant 0 : i32
    %c0_i32_1 = arith.constant 0 : i32
    return %c0_i32, %c0_i32_0 : i32, i32
  }
  func.func @transform_9(%arg0: i32) -> (i32, i32) {
    %c0_i32 = arith.constant 0 : i32
    %c0_i32_0 = arith.constant 0 : i32
    return %arg0, %c0_i32 : i32, i32
  }
  func.func @transform_10(%arg0: i32) -> (i32, i32) {
    %c0_i32 = arith.constant 0 : i32
    %c0_i32_0 = arith.constant 0 : i32
    return %arg0, %c0_i32 : i32, i32
  }
}

module attributes {stable_mosaic.version = 11 : i64} {
  func.func @network_kernel(%arg0: i32, %arg1: memref<16x8xf32, #tpu.memory_space<vmem>>, %arg2: memref<8x16xf32, #tpu.memory_space<vmem>>, %arg3: memref<1x16xf32, #tpu.memory_space<vmem>>, %arg4: memref<1x16xf32, #tpu.memory_space<vmem>>, %arg5: memref<16x256xbf16, #tpu.memory_space<vmem>>, %arg6: memref<1x256xf32, #tpu.memory_space<vmem>>, %arg7: memref<256x256xbf16, #tpu.memory_space<vmem>>, %arg8: memref<1x256xf32, #tpu.memory_space<vmem>>, %arg9: memref<256x128xbf16, #tpu.memory_space<vmem>>, %arg10: memref<16x256xf32, #tpu.memory_space<vmem>>, %arg11: memref<16x128xf32, #tpu.memory_space<vmem>>) attributes {dimension_semantics = [#tpu.dimension_semantics<parallel>], iteration_bounds = array<i64: 3>, scalar_prefetch = 0 : i64, scratch_operands = 0 : i64, tpu.core_type = #tpu.core_type<tc>, window_params = [{transform_indices = @transform_0, window_bounds = array<i64: 16, 8>}, {pipeline_mode = #tpu.pipeline_mode<synchronous>, transform_indices = @transform_1, window_bounds = array<i64: 8, 16>}, {pipeline_mode = #tpu.pipeline_mode<synchronous>, transform_indices = @transform_2, window_bounds = array<i64: 1, 16>}, {pipeline_mode = #tpu.pipeline_mode<synchronous>, transform_indices = @transform_3, window_bounds = array<i64: 1, 16>}, {pipeline_mode = #tpu.pipeline_mode<synchronous>, transform_indices = @transform_4, window_bounds = array<i64: 16, 256>}, {pipeline_mode = #tpu.pipeline_mode<synchronous>, transform_indices = @transform_5, window_bounds = array<i64: 1, 256>}, {pipeline_mode = #tpu.pipeline_mode<synchronous>, transform_indices = @transform_6, window_bounds = array<i64: 256, 256>}, {pipeline_mode = #tpu.pipeline_mode<synchronous>, transform_indices = @transform_7, window_bounds = array<i64: 1, 256>}, {pipeline_mode = #tpu.pipeline_mode<synchronous>, transform_indices = @transform_8, window_bounds = array<i64: 256, 128>}, {transform_indices = @transform_9, window_bounds = array<i64: 16, 256>}, {transform_indices = @transform_10, window_bounds = array<i64: 16, 128>}]} {
    %c0 = arith.constant 0 : index
    %c0_0 = arith.constant 0 : index
    %0 = vector.load %arg1[%c0, %c0_0] : memref<16x8xf32, #tpu.memory_space<vmem>>, vector<16x8xf32>
    %1 = arith.mulf %0, %0 : vector<16x8xf32>
    %cst = arith.constant dense<0.000000e+00> : vector<16xf32>
    %2 = vector.multi_reduction <add>, %1, %cst [1] : vector<16x8xf32> to vector<16xf32>
    %3 = vector.shape_cast %2 : vector<16xf32> to vector<16x1xf32>
    %c0_1 = arith.constant 0 : index
    %c0_2 = arith.constant 0 : index
    %4 = vector.load %arg2[%c0_1, %c0_2] : memref<8x16xf32, #tpu.memory_space<vmem>>, vector<8x16xf32>
    %cst_3 = arith.constant dense<0.000000e+00> : vector<16x16xf32>
    %5 = tpu.matmul %0, %4, %cst_3 {dimension_numbers = #tpu.dot_dimension_numbers<[1], [0], [0], [1], [0, 0, 1, 1], [], []>} : vector<16x8xf32>, vector<8x16xf32>, vector<16x16xf32> -> vector<16x16xf32>
    %c0_4 = arith.constant 0 : index
    %c0_5 = arith.constant 0 : index
    %6 = vector.load %arg3[%c0_4, %c0_5] : memref<1x16xf32, #tpu.memory_space<vmem>>, vector<1x16xf32>
    %7 = vector.broadcast %6 : vector<1x16xf32> to vector<16x16xf32>
    %8 = vector.broadcast %3 : vector<16x1xf32> to vector<16x16xf32>
    %9 = arith.mulf %7, %8 : vector<16x16xf32>
    %10 = arith.subf %5, %9 : vector<16x16xf32>
    %c0_6 = arith.constant 0 : index
    %c0_7 = arith.constant 0 : index
    %11 = vector.load %arg4[%c0_6, %c0_7] : memref<1x16xf32, #tpu.memory_space<vmem>>, vector<1x16xf32>
    %12 = vector.broadcast %11 : vector<1x16xf32> to vector<16x16xf32>
    %13 = arith.addf %10, %12 : vector<16x16xf32>
    %cst_8 = arith.constant 0.000000e+00 : f32
    %14 = vector.broadcast %cst_8 : f32 to vector<16x16xf32>
    %15 = arith.minimumf %13, %14 : vector<16x16xf32>
    %16 = math.exp %15 : vector<16x16xf32>
    %17 = arith.truncf %16 : vector<16x16xf32> to vector<16x16xbf16>
    %c0_9 = arith.constant 0 : index
    %c0_10 = arith.constant 0 : index
    %18 = vector.load %arg5[%c0_9, %c0_10] : memref<16x256xbf16, #tpu.memory_space<vmem>>, vector<16x256xbf16>
    %cst_11 = arith.constant dense<0.000000e+00> : vector<16x256xf32>
    %19 = tpu.matmul %17, %18, %cst_11 {dimension_numbers = #tpu.dot_dimension_numbers<[1], [0], [0], [1], [0, 0, 1, 1], [], []>} : vector<16x16xbf16>, vector<16x256xbf16>, vector<16x256xf32> -> vector<16x256xf32>
    %c0_12 = arith.constant 0 : index
    %c0_13 = arith.constant 0 : index
    %20 = vector.load %arg6[%c0_12, %c0_13] : memref<1x256xf32, #tpu.memory_space<vmem>>, vector<1x256xf32>
    %21 = vector.broadcast %20 : vector<1x256xf32> to vector<16x256xf32>
    %22 = arith.addf %19, %21 : vector<16x256xf32>
    %cst_14 = arith.constant 0.000000e+00 : f32
    %23 = vector.broadcast %cst_14 : f32 to vector<16x256xf32>
    %24 = arith.maximumf %22, %23 : vector<16x256xf32>
    %25 = arith.truncf %24 : vector<16x256xf32> to vector<16x256xbf16>
    %cst_15 = arith.constant 0.000000e+00 : f32
    %26 = vector.broadcast %cst_15 : f32 to vector<16x128xf32>
    %c0_16 = arith.constant 0 : index
    %c0_17 = arith.constant 0 : index
    %27 = vector.load %arg7[%c0_16, %c0_17] : memref<256x256xbf16, #tpu.memory_space<vmem>>, vector<256x128xbf16>
    %cst_18 = arith.constant dense<0.000000e+00> : vector<16x128xf32>
    %28 = tpu.matmul %25, %27, %cst_18 {dimension_numbers = #tpu.dot_dimension_numbers<[1], [0], [0], [1], [0, 0, 1, 1], [], []>} : vector<16x256xbf16>, vector<256x128xbf16>, vector<16x128xf32> -> vector<16x128xf32>
    %c0_19 = arith.constant 0 : index
    %c0_20 = arith.constant 0 : index
    %29 = vector.load %arg8[%c0_19, %c0_20] : memref<1x256xf32, #tpu.memory_space<vmem>>, vector<1x128xf32>
    %30 = vector.broadcast %29 : vector<1x128xf32> to vector<16x128xf32>
    %31 = arith.addf %28, %30 : vector<16x128xf32>
    %32 = math.exp %31 : vector<16x128xf32>
    %33 = arith.truncf %32 : vector<16x128xf32> to vector<16x128xbf16>
    %c0_21 = arith.constant 0 : index
    %c0_22 = arith.constant 0 : index
    %34 = vector.load %arg9[%c0_21, %c0_22] : memref<256x128xbf16, #tpu.memory_space<vmem>>, vector<128x128xbf16>
    %cst_23 = arith.constant dense<0.000000e+00> : vector<16x128xf32>
    %35 = tpu.matmul %33, %34, %cst_23 {dimension_numbers = #tpu.dot_dimension_numbers<[1], [0], [0], [1], [0, 0, 1, 1], [], []>} : vector<16x128xbf16>, vector<128x128xbf16>, vector<16x128xf32> -> vector<16x128xf32>
    %36 = arith.addf %26, %35 : vector<16x128xf32>
    %c0_24 = arith.constant 0 : index
    %c0_25 = arith.constant 0 : index
    %37 = vector.load %arg10[%c0_24, %c0_25] : memref<16x256xf32, #tpu.memory_space<vmem>>, vector<16x128xf32>
    tpu.vector_store %arg10[%c0_24, %c0_25], %32 {strides = array<i32>} : memref<16x256xf32, #tpu.memory_space<vmem>>, vector<16x128xf32>,
    %c0_26 = arith.constant 0 : index
    %c128 = arith.constant 128 : index
    %38 = vector.load %arg7[%c0_26, %c128] : memref<256x256xbf16, #tpu.memory_space<vmem>>, vector<256x128xbf16>
    %cst_27 = arith.constant dense<0.000000e+00> : vector<16x128xf32>
    %39 = tpu.matmul %25, %38, %cst_27 {dimension_numbers = #tpu.dot_dimension_numbers<[1], [0], [0], [1], [0, 0, 1, 1], [], []>} : vector<16x256xbf16>, vector<256x128xbf16>, vector<16x128xf32> -> vector<16x128xf32>
    %c0_28 = arith.constant 0 : index
    %c128_29 = arith.constant 128 : index
    %40 = vector.load %arg8[%c0_28, %c128_29] : memref<1x256xf32, #tpu.memory_space<vmem>>, vector<1x128xf32>
    %41 = vector.broadcast %40 : vector<1x128xf32> to vector<16x128xf32>
    %42 = arith.addf %39, %41 : vector<16x128xf32>
    %43 = math.exp %42 : vector<16x128xf32>
    %44 = arith.truncf %43 : vector<16x128xf32> to vector<16x128xbf16>
    %c128_30 = arith.constant 128 : index
    %c0_31 = arith.constant 0 : index
    %45 = vector.load %arg9[%c128_30, %c0_31] : memref<256x128xbf16, #tpu.memory_space<vmem>>, vector<128x128xbf16>
    %cst_32 = arith.constant dense<0.000000e+00> : vector<16x128xf32>
    %46 = tpu.matmul %44, %45, %cst_32 {dimension_numbers = #tpu.dot_dimension_numbers<[1], [0], [0], [1], [0, 0, 1, 1], [], []>} : vector<16x128xbf16>, vector<128x128xbf16>, vector<16x128xf32> -> vector<16x128xf32>
    %47 = arith.addf %36, %46 : vector<16x128xf32>
    %c0_33 = arith.constant 0 : index
    %c128_34 = arith.constant 128 : index
    %48 = vector.load %arg10[%c0_33, %c128_34] : memref<16x256xf32, #tpu.memory_space<vmem>>, vector<16x128xf32>
    tpu.vector_store %arg10[%c0_33, %c128_34], %43 {strides = array<i32>} : memref<16x256xf32, #tpu.memory_space<vmem>>, vector<16x128xf32>,
    %49 = vector.extract_strided_slice %47 {offsets = [0, 0], sizes = [16, 1], strides = [1, 1]} : vector<16x128xf32> to vector<16x1xf32>
    %cst_35 = arith.constant 1.000000e+00 : f32
    %50 = vector.broadcast %cst_35 : f32 to vector<16x1xf32>
    %51 = arith.divf %50, %49 : vector<16x1xf32>
    %c0_36 = arith.constant 0 : index
    %c0_37 = arith.constant 0 : index
    %52 = vector.load %arg10[%c0_36, %c0_37] : memref<16x256xf32, #tpu.memory_space<vmem>>, vector<16x256xf32>
    %53 = vector.broadcast %51 : vector<16x1xf32> to vector<16x256xf32>
    %54 = arith.mulf %52, %53 : vector<16x256xf32>
    %c0_38 = arith.constant 0 : index
    %c0_39 = arith.constant 0 : index
    %55 = vector.load %arg10[%c0_38, %c0_39] : memref<16x256xf32, #tpu.memory_space<vmem>>, vector<16x256xf32>
    tpu.vector_store %arg10[%c0_38, %c0_39], %54 {strides = array<i32>} : memref<16x256xf32, #tpu.memory_space<vmem>>, vector<16x256xf32>,
    %56 = vector.broadcast %51 : vector<16x1xf32> to vector<16x128xf32>
    %57 = arith.mulf %47, %56 : vector<16x128xf32>
    %c0_40 = arith.constant 0 : index
    %c0_41 = arith.constant 0 : index
    %58 = vector.load %arg11[%c0_40, %c0_41] : memref<16x128xf32, #tpu.memory_space<vmem>>, vector<16x128xf32>
    tpu.vector_store %arg11[%c0_40, %c0_41], %57 {strides = array<i32>} : memref<16x128xf32, #tpu.memory_space<vmem>>, vector<16x128xf32>,
    return
  }
  func.func @transform_0(%arg0: i32) -> (i32, i32) {
    %c0_i32 = arith.constant 0 : i32
    %c0_i32_0 = arith.constant 0 : i32
    return %arg0, %c0_i32 : i32, i32
  }
  func.func @transform_1(%arg0: i32) -> (i32, i32) {
    %c0_i32 = arith.constant 0 : i32
    %c0_i32_0 = arith.constant 0 : i32
    %c0_i32_1 = arith.constant 0 : i32
    return %c0_i32, %c0_i32_0 : i32, i32
  }
  func.func @transform_2(%arg0: i32) -> (i32, i32) {
    %c0_i32 = arith.constant 0 : i32
    %c0_i32_0 = arith.constant 0 : i32
    %c0_i32_1 = arith.constant 0 : i32
    return %c0_i32, %c0_i32_0 : i32, i32
  }
  func.func @transform_3(%arg0: i32) -> (i32, i32) {
    %c0_i32 = arith.constant 0 : i32
    %c0_i32_0 = arith.constant 0 : i32
    %c0_i32_1 = arith.constant 0 : i32
    return %c0_i32, %c0_i32_0 : i32, i32
  }
  func.func @transform_4(%arg0: i32) -> (i32, i32) {
    %c0_i32 = arith.constant 0 : i32
    %c0_i32_0 = arith.constant 0 : i32
    %c0_i32_1 = arith.constant 0 : i32
    return %c0_i32, %c0_i32_0 : i32, i32
  }
  func.func @transform_5(%arg0: i32) -> (i32, i32) {
    %c0_i32 = arith.constant 0 : i32
    %c0_i32_0 = arith.constant 0 : i32
    %c0_i32_1 = arith.constant 0 : i32
    return %c0_i32, %c0_i32_0 : i32, i32
  }
  func.func @transform_6(%arg0: i32) -> (i32, i32) {
    %c0_i32 = arith.constant 0 : i32
    %c0_i32_0 = arith.constant 0 : i32
    %c0_i32_1 = arith.constant 0 : i32
    return %c0_i32, %c0_i32_0 : i32, i32
  }
  func.func @transform_7(%arg0: i32) -> (i32, i32) {
    %c0_i32 = arith.constant 0 : i32
    %c0_i32_0 = arith.constant 0 : i32
    %c0_i32_1 = arith.constant 0 : i32
    return %c0_i32, %c0_i32_0 : i32, i32
  }
  func.func @transform_8(%arg0: i32) -> (i32, i32) {
    %c0_i32 = arith.constant 0 : i32
    %c0_i32_0 = arith.constant 0 : i32
    %c0_i32_1 = arith.constant 0 : i32
    return %c0_i32, %c0_i32_0 : i32, i32
  }
  func.func @transform_9(%arg0: i32) -> (i32, i32) {
    %c0_i32 = arith.constant 0 : i32
    %c0_i32_0 = arith.constant 0 : i32
    return %arg0, %c0_i32 : i32, i32
  }
  func.func @transform_10(%arg0: i32) -> (i32, i32) {
    %c0_i32 = arith.constant 0 : i32
    %c0_i32_0 = arith.constant 0 : i32
    return %arg0, %c0_i32 : i32, i32
  }
}

</mosaic_0001>

<bundles_post_ra>
// kernel: tpu_custom_call.1
= control target key start
LH: loop header
LB: loop body
LE: loop exit
PB: predicated region body
PF: predicated region fallthrough
CT: control target
= control target key end

     0   :  { %16 = vsyncpa [#allocation3], 0  ;;  %s2187_s0 = inlined_call_operand.vmem [shape: f32[48,8], index: 0, kind: input, shape index: {}]   ;;  %s2188_s1 = inlined_call_operand.vmem [shape: f32[8,16], index: 1, kind: input, shape index: {}]   ;;  %s2189_s2 = inlined_call_operand.vmem [shape: f32[1,16], index: 2, kind: input, shape index: {}]   ;;  %s2190_s3 = inlined_call_operand.vmem [shape: f32[1,16], index: 3, kind: input, shape index: {}]   ;;  %s2191_s4 = inlined_call_operand.vmem [shape: bf16[16,256], index: 4, kind: input, shape index: {}]   ;;  %s2192_s5 = inlined_call_operand.vmem [shape: f32[1,256], index: 5, kind: input, shape index: {}]   ;;  %s2193_s6 = inlined_call_operand.hbm [shape: bf16[256,256], index: 6, kind: input, shape index: {}]   ;;  %s2194_s7 = inlined_call_operand.vmem [shape: f32[1,256], index: 7, kind: input, shape index: {}]   ;;  %s2195_s8 = inlined_call_operand.hbm [shape: bf16[256,128], index: 8, kind: input, shape index: {}]   ;;  %s2196_s9 = inlined_call_operand.hbm [shape: f32[48,256], index: 9, kind: output, shape index: {0}]   ;;  %s2197_s10 = inlined_call_operand.hbm [shape: f32[48,128], index: 10, kind: output, shape index: {1}]  }
   0x1   :  { %17 = vsyncpa [#allocation6], 0 }
   0x2   :  { %18 = vsyncpa [#allocation4], 0 }
   0x3   :  { %20 = vsyncpa [#allocation4 + $0x1], 0 }
   0x4   :  { %21 = vsyncpa [#allocation9], 0 }
   0x5   :  { %23 = vsyncpa [#allocation9 + $0x1], 0  ;;  %s1929_s13 = smov 0   ;;  %s1931_s14 = smov 0  }
   0x6   :  { %s1933_s15 = smov 0   ;;  %s1935_s16 = smov 0  }
   0x7 LB: > { %2205 = sst [smem:[#allocation14_spill]] %s1853_s15  ;;  %s1950_s17 = sadd.s32 4294967295, %s1857_s16   ;;  %s1857_s16 = sphi %s1935_s16, %s2221_s16   ;;  %s1853_s15 = sphi %s1933_s15, %s2223_s15   ;;  %s1849_s14 = sphi %s1931_s14, %s2225_s14   ;;  %s1845_s13 = sphi %s1929_s13, %s2224_s13  }
   0x8   : > { %s1359_s18 = sadd.s32 4294967294, %s1857_s16   ;;  %s1954_s19 = sadd.s32 1, %s1857_s16  }
   0x9   : > { %2206 = sst [smem:[#allocation15_spill]] %s1954_s19  ;;  %s230_s20 = sadd.s32 1, %s1853_s15 }
   0xa   : > { %s227_s21 = ssub.s32 %s1857_s16, %s1954_s19  ;;  %p240_p0 = scmp.ne.s32.totalorder %s1853_s15, %s1849_s14 }
   0xb   : > { %p228_p1 = scmp.eq.s32.totalorder %s227_s21, 0  ;;  %p241_p2 = scmp.eq.s32.totalorder %s1950_s17, 2 }
   0xc   : > { %p246_p3 = scmp.ne.s32.totalorder %s1849_s14, %s1845_s13  ;;  %p247_p4 = scmp.eq.s32.totalorder %s1359_s18, 2 }
   0xd   : > { %s1965_s22 = scalar_select %p228_p1, %s1853_s15, %s230_s20  }
   0xe   : > { %p1967_p5 = por %p241_p2, %p240_p0  ;;  %p1971_p6 = por %p247_p4, %p246_p3 }
   0xf   : > { %2207 = sst [smem:[#allocation16_spill]] %s1965_s22  ;;  %p1360_p7 = scmp.ge.s32.totalorder %s1857_s16, 1 }
  0x10   : > { %s2208_s23 = scalar_select %p1967_p5, 1, 0 }
  0x11   : > { %s2209_s24 = scalar_select %p1971_p6, 1, 0 }
  0x12   : > { %p280_p8 = scmp.lt.s32.totalorder %s1857_s16, 4  ;;  %p2198_p9 = scmp.eq.s32.totalorder %s1950_s17, 0 }
  0x13   : > { %2210 = sst [smem:[#allocation17_spill]] %s2209_s24  ;;  %s1859_s26 = smov [#allocation2]  }
  0x14   : > { %p1978_p10 = pnand %p1360_p7, %p280_p8  ;;  %s307_s27 = sshll.u32 %s1859_s26, 4  ;;  %s308_s27 = int_to_ptr.vmem [resolvable:$true] %s307_s27 }
  0x15   : > { %s1860_s29 = smov [#allocation5]   ;;  %s1699_s18 = scalar_lea.hbm %s2193_s6, 4096 }
  0x16   : > { %s2211_s25 = scalar_select %p1978_p10, 1, 0 }
  0x17   : > { %p1566_p11 = pneg %p1978_p10  ;;  %s323_s30 = sshll.u32 %s1860_s29, 4  ;;  %s1990_s30 = int_to_ptr.vmem [resolvable:$true] %s323_s30 }
  0x18   : > { %p1700_p13 = scmp.ne.s32.totalorder %s2193_s6, %s1699_s18  ;;  %p1706_p3 = scmp.lt.u32.totalorder %s1699_s18, %s2193_s6 }
  0x19   : > { %p1986_p12 = pnand %p2198_p9, %p1566_p11 }
  0x1b   : > { %p1701_p0 = pneg %p1986_p12 }
  0x1d   : > { %p1702_p1 = pnand %p1701_p0, %p1700_p13 }
  0x1f   : > { %p1703_p2 = pneg %p1702_p1 }
  0x21   : > { %p1708_p4 = pnand %p1706_p3, %p1703_p2 }
  0x23   : > { %1711 = shalt.err (!%p1708_p4)
}
  0x24   : > { %s1712_s29 = scalar_lea.vmem %s308_s27, 4096  ;;  %p1720_p9 = scmp.lt.s32.totalorder %s308_s27, %s308_s27 }
  0x25   : > { %p1713_p7 = scmp.ne.s32.totalorder %s308_s27, %s1712_s29  ;;  %p1721_p6 = scmp.lt.s32.totalorder %s1712_s29, %s1712_s29 }
  0x27   : > { %p1715_p8 = pnand %p1713_p7, %p1701_p0  ;;  %p1722_p5 = por %p1721_p6, %p1720_p9 }
  0x29   : > { %p1716_p11 = pneg %p1715_p8 }
  0x2b   : > { %p1723_p10 = pnand %p1722_p5, %p1716_p11 }
  0x2d   : > { %1726 = shalt.err (!%p1723_p10)
}
  0x2e   : > { %s1861_s11 = smov 128   ;;  %s1862_s12 = smov 8  }
  0x2f   : > { %1569 = dma.hbm_to_vmem [thread:$0]  (!%p1986_p12), %s2193_s6, 4096, %s308_s27, [#allocation3], %s1861_s11, %s1861_s11, %s1862_s12  }
  0x30   : > { %s1727_s26 = scalar_lea.hbm %s2195_s8, 2048 }
  0x31   : > { %p1728_p13 = scmp.ne.s32.totalorder %s2195_s8, %s1727_s26  ;;  %p1734_p9 = scmp.lt.u32.totalorder %s1727_s26, %s2195_s8 }
  0x33   : > { %p1730_p5 = pnand %p1728_p13, %p1701_p0 }
  0x35   : > { %p1731_p6 = pneg %p1730_p5 }
  0x37   : > { %p1736_p10 = pnand %p1734_p9, %p1731_p6 }
  0x39   : > { %1739 = shalt.err (!%p1736_p10)
}
  0x3a   : > { %s1740_s27 = scalar_lea.vmem %s1990_s30, 2048  ;;  %p1748_p4 = scmp.lt.s32.totalorder %s1990_s30, %s1990_s30 }
  0x3b   : > { %p1741_p1 = scmp.ne.s32.totalorder %s1990_s30, %s1740_s27  ;;  %p1749_p7 = scmp.lt.s32.totalorder %s1740_s27, %s1740_s27 }
  0x3d   : > { %p1743_p2 = pnand %p1741_p1, %p1701_p0  ;;  %p1750_p8 = por %p1749_p7, %p1748_p4 }
  0x3f   : > { %p1744_p3 = pneg %p1743_p2 }
  0x41   : > { %p1751_p11 = pnand %p1750_p8, %p1744_p3 }
  0x43   : > { %1754 = shalt.err (!%p1751_p11)
}
  0x44   : > { %s1863_s15 = smov 64   ;;  %s1864_s19 = smov 4  }
  0x45   : > { %1572 = dma.hbm_to_vmem [thread:$0]  (!%p1986_p12), %s2195_s8, 2048, %s1990_s30, [#allocation6], %s1863_s15, %s1863_s15, %s1864_s19  }
  0x46   : > { %p2213_p13 = scmp.ne.s32.totalorder %s2211_s25, 0 }
  0x47   : > { %p2214_p0 = scmp.eq.s32.totalorder (!%p2213_p13), %s1950_s17, 0 }
  0x48   : > { %348 = sbr.rel (%p2213_p13) target bundleno = 1242 (0x4da), region = 56 }
  0x4f   : > { %1828 = dma.done.wait (%p2214_p0), [#allocation3], 4096   ;;  %p2215_p5 = pmov %p2214_p0 }
  0x50   : > { %p2216_p6 = pmov %p2214_p0 }
  0x51   : > { %1830 = vsyncadd (%p2215_p5), [#allocation3], 4294963200 }
  0x52   : > { %1832 = dma.done.wait (%p2216_p6), [#allocation6], 2048   ;;  %p2217_p9 = pmov %p2214_p0 }
  0x53   : > { %s1369_s28 = sshll.u32 %s1950_s17, 1  ;;  %vm408_vm0 = vcmask 64512   ;;  %v415_v0 = vld [vmem:[%s2188_s1] sm:$0xff]  ;;  %v1865_v9 = vmov 0   ;;  %vm548_vm1 = vcmask 130048   ;;  %v528_v46 = vlaneseq  ;;  %s2101_s20 = sand.u32 1, %s1849_s14  }
  0x54   : > { %1834 = vsyncadd (%p2217_p9), [#allocation6], 4294965248  ;;  %p396_p10 = scmp.lt.s32.totalorder %s1369_s28, 5  ;;  %1505 = vmatprep.subr.mxu0 %v415_v0  ;;  %v1632_v7 = vld [vmem:[%s2191_s4 + $0x4] ss:$8 sps:$4 sm:$0xff]   ;;  %584 = vmatprep.mubr.bf16.mxu1 %v1865_v9  ;;  %vm1867_vm2 = vmmov 0  }
  0x55   : > { %1506 = vmatpush3.msra.mxu0 %v415_v0  ;;  %v1634_v8 = vld [vmem:[%s2191_s4] ss:$8 sps:$4 sm:$0xff]   ;;  %1630 = vset.pattern.permute.xlu1 %v1865_v9  ;;  %v1637_v31 = vld [vmem:[#allocation2 + $0x90] ss:$8 sps:$4 sm:$0xff]   ;;  %v1651_v45 = vld [vmem:[#allocation2 + $0x84] ss:$8 sps:$4 sm:$0xff]  }
  0x56   : > { %s2227_s28 = smov (!%p396_p10, %s1369_s28), 5  ;;  %552 = vmatprep.subr.bf16.mxu1 %v1632_v7  ;;  %1631 = vset.pattern.permute.xlu0 %v1865_v9  ;;  %v1635_v10 = vld [vmem:[#allocation2 + $0x80] ss:$8 sps:$4 sm:$0xff]   ;;  %v1638_v32 = vld [vmem:[#allocation2 + $0x10] ss:$8 sps:$4 sm:$0xff]   ;;  %v529_v47 = vshrl.u32 %v528_v46, 7 }
  0x57   : > { %s1370_s30 = sshll.u32 %s2227_s28, 3  ;;  %553 = vmatpush1.bf16.msra.mxu1 %v1634_v8  ;;  %v1373_v13 = vld [vmem:[%s2189_s2] ss:$0 sm:$0xff]  ;;  %v1641_v35 = vld [vmem:[#allocation2 + $0xb0] ss:$8 sps:$4 sm:$0xff]   ;;  %s1368_s21 = sshll.u32 %s2101_s20, 4 }
  0x58   : > { %s399_s22 = scalar_lea.vmem %s2187_s0, %s1370_s30  ;;  %1443 = vmatprep.subr.bf16.mxu1 %v1635_v10  ;;  %v1374_v17 = vld [vmem:[%s2190_s3] ss:$0 sm:$0xff]  ;;  %v1642_v36 = vld [vmem:[#allocation2 + $0x30] ss:$8 sps:$4 sm:$0xff]   ;;  %v530_v48 = vsub.s32 0, %v529_v47  ;;  %v534_v50 = vsub.s32 1, %v529_v47 }
  0x59   : > { %v404_v1 = vld [vmem:[%s399_s22] sm:$0xff]  ;;  %v405_v2 = vld [vmem:[%s399_s22 + $0x8] sm:$0xff]  ;;  %v1645_v39 = vld [vmem:[#allocation2 + $0xd0] ss:$8 sps:$4 sm:$0xff]   ;;  %s1367_s26 = sshll.u32 %s2101_s20, 5  ;;  %s394_s29 = scalar_lea.vmem [#allocation8], %s1368_s21 }
  0x5a   : > { %v406_v3 = vmul.f32 %v404_v1, %v404_v1  ;;  %1507 = vmatprep.mubr.msk.f32.mxu0 %vm408_vm0, %v404_v1  ;;  %v407_v4 = vmul.f32 %v405_v2, %v405_v2  ;;  %v1636_v29 = vld [vmem:[#allocation2] ss:$8 sps:$4 sm:$0xff]   ;;  %v1646_v40 = vld [vmem:[#allocation2 + $0x50] ss:$8 sps:$4 sm:$0xff]   ;;  %v1656_v7 = vld [vmem:[#allocation2 + $0x24] ss:$8 sps:$4 sm:$0xff]  }
  0x5b   : > { %1508 = vmatmul.mubr.msk.f32.vlgmr.msra.gmra.mrb[0].mxu0 %vm408_vm0, %v405_v2  ;;  %v1639_v33 = vld [vmem:[#allocation2 + $0xa0] ss:$8 sps:$4 sm:$0xff]   ;;  %v1649_v43 = vld [vmem:[#allocation2 + $0xf0] ss:$8 sps:$4 sm:$0xff]   ;;  %v1657_v8 = vld [vmem:[#allocation2 + $0xb4] ss:$8 sps:$4 sm:$0xff]  }
  0x5c   : > { %v409_v5 = vsel %vm408_vm0, %v406_v3, 0.0  ;;  %v412_v6 = vsel %vm408_vm0, %v407_v4, 0.0  ;;  %v1640_v34 = vld [vmem:[#allocation2 + $0x20] ss:$8 sps:$4 sm:$0xff]   ;;  %v1650_v44 = vld [vmem:[#allocation2 + $0x70] ss:$8 sps:$4 sm:$0xff]  }
  0x5d   : > { %410 = vadd.xlane.f32.xlu0 %v409_v5  ;;  %v1643_v37 = vld [vmem:[#allocation2 + $0xc0] ss:$8 sps:$4 sm:$0xff]   ;;  %v1652_v3 = vld [vmem:[#allocation2 + $0x4] ss:$8 sps:$4 sm:$0xff]   ;;  %v1653_v4 = vld [vmem:[#allocation2 + $0x94] ss:$8 sps:$4 sm:$0xff]  }
  0x5e   : > { %v1644_v38 = vld [vmem:[#allocation2 + $0x40] ss:$8 sps:$4 sm:$0xff]   ;;  %v1654_v5 = vld [vmem:[#allocation2 + $0x14] ss:$8 sps:$4 sm:$0xff]   ;;  %v1659_v10 = vld [vmem:[#allocation2 + $0xc4] ss:$8 sps:$4 sm:$0xff]  }
  0x5f   : > { %v1647_v41 = vld [vmem:[#allocation2 + $0xe0] ss:$8 sps:$4 sm:$0xff]   ;;  %v1658_v9 = vld [vmem:[#allocation2 + $0x34] ss:$8 sps:$4 sm:$0xff]   ;;  %s1243_s27 = sshll.u32 %s394_s29, 4  ;;  %s1438_s15 = sshll.u32 %s1950_s17, 9  ;;  %s2106_s27 = int_to_ptr.vmem [resolvable:$true] %s1243_s27 }
  0x60   : > { %v1648_v42 = vld [vmem:[#allocation2 + $0x60] ss:$8 sps:$4 sm:$0xff]   ;;  %s387_s19 = scalar_lea.vmem [#allocation7], %s1367_s26  ;;  %s1439_s11 = sshll.u32 %s1950_s17, 8 }
  0x61   : > { %413 = vadd.xlane.f32.xlu0 %v412_v6  ;;  %v526_v49 = vld [vmem:[%s2192_s5] sm:$0x3]  ;;  %v1655_v6 = vld [vmem:[#allocation2 + $0xa4] ss:$8 sps:$4 sm:$0xff]   ;;  %s1227_s24 = sshll.u32 %s387_s19, 4  ;;  %s2112_s25 = scalar_lea.hbm %s2196_s9, %s1438_s15  ;;  %s2114_s24 = int_to_ptr.vmem [resolvable:$true] %s1227_s24 }
  0x62   : > { %v531_v51 = vrot.slane %v526_v49, %v530_v48  ;;  %v535_v52 = vrot.slane %v526_v49, %v534_v50  ;;  %v1675_v46 = vld [vmem:[#allocation5] sm:$0xff]   ;;  %v1676_v48 = vld [vmem:[#allocation5 + $0x8] sm:$0xff]   ;;  %v1677_v49 = vld [vmem:[#allocation5 + $0x10] sm:$0xff]   ;;  %s2120_s22 = scalar_lea.hbm %s2197_s10, %s1439_s11  ;;  %s1208_s18 = scalar_lea.sflag [#allocation4], %s2101_s20 }
  0x63   : > { %v1378_v50 = vld [vmem:[%s2194_s7] ss:$0 sm:$0xff]  ;;  %s1755_s21 = scalar_lea.vmem %s2114_s24, 512  ;;  %p2218_p1 = scmp.ne.s32.totalorder %s2208_s23, 0 }
  0x64   : > { %p1756_p12 = scmp.ne.s32.totalorder %s2114_s24, %s1755_s21  ;;  %s1868_s26 = smov [#allocation7]  }
  0x65   : > { %s1759_s15 = sshll.u32 %s1868_s26, 4  ;;  %s1760_s15 = int_to_ptr.vmem [resolvable:$false] %s1759_s15 }
  0x66   : > { %p1757_p2 = pnand %p1756_p12, %p2218_p1  ;;  %s1761_s28 = scalar_lea.vmem %s1760_s15, 1024 }
  0x67   : > { %p1762_p4 = scmp.lt.s32.totalorder %s2114_s24, %s1760_s15  ;;  %p1763_p7 = scmp.lt.s32.totalorder %s1761_s28, %s1755_s21 }
  0x68   : > { %p1758_p3 = pneg %p1757_p2 }
  0x69   : > { %p1764_p8 = por %p1763_p7, %p1762_p4 }
  0x6b   : > { %p1765_p11 = pnand %p1764_p8, %p1758_p3 }
  0xea   : > { %v411_v11 = vpop.xlane.xlu0 %410 }
  0xeb   : > { %v504_v15 = vmul.f32 %v1373_v13, %v411_v11  ;;  %v1660_v11 = vld [vmem:[#allocation2 + $0x44] ss:$8 sps:$4 sm:$0xff]  }
  0xee   : > { %v414_v12 = vpop.xlane.xlu0 %413 }
  0xef   : > { %v505_v14 = vmul.f32 %v1373_v13, %v414_v12  ;;  %v1661_v12 = vld [vmem:[#allocation2 + $0xd4] ss:$8 sps:$4 sm:$0xff]  }
  0xf0   : > { %v1662_v13 = vld [vmem:[#allocation2 + $0x54] ss:$8 sps:$4 sm:$0xff]  }
 0x12e   : > { %v1509_v16 = vpop.f32.mrb[0].mxu0 }
 0x12f   : > { %v507_v18 = vsub.f32 %v1509_v16, %v505_v14  ;;  %v488_v19 = vpop.f32.mrb[1].mxu0  ;;  %v1663_v14 = vld [vmem:[#allocation2 + $0xe4] ss:$8 sps:$4 sm:$0xff]   ;;  %v1665_v16 = vld [vmem:[#allocation2 + $0xf4] ss:$8 sps:$4 sm:$0xff]  }
 0x130   : > { %v506_v20 = vsub.f32 %v488_v19, %v504_v15  ;;  %v1664_v15 = vld [vmem:[#allocation2 + $0x64] ss:$8 sps:$4 sm:$0xff]   ;;  %v1866_v19 = vmov 0.0  }
 0x131   : > { %v516_v21 = vadd.f32 %v1374_v17, %v507_v18  ;;  %v1667_v18 = vld [vmem:[#allocation5 + $0x40] sm:$0xff]   ;;  %1510 = vmatprep.subr.bf16.mxu0 %v1866_v19  ;;  %1526 = vmatprep.mubr.msk.bf16.mxu0 %vm1867_vm2, %v1866_v19 }
 0x132   : > { %v515_v22 = vadd.f32 %v1374_v17, %v506_v20  ;;  %v1666_v17 = vld [vmem:[#allocation2 + $0x74] ss:$8 sps:$4 sm:$0xff]   ;;  %1511 = vmatpush3.bf16.msra.mxu0 %v1667_v18  ;;  %v1668_v20 = vld [vmem:[#allocation5 + $0x48] sm:$0xff]  }
 0x133   : > { %v518_v23 = vmin.f32 %v516_v21, 0.0  ;;  %1512 = vmatprep.subr.bf16.mxu0 %v1866_v19  ;;  %v1669_v21 = vld [vmem:[#allocation5 + $0x50] sm:$0xff]  }
 0x134   : > { %v517_v24 = vmin.f32 %v515_v22, 0.0  ;;  %v1670_v22 = vld [vmem:[#allocation5 + $0x58] sm:$0xff]  }
 0x135   : > { %v521_v25 = vmul.f32 1.442695, %v518_v23  ;;  %v1671_v23 = vld [vmem:[#allocation5 + $0x60] sm:$0xff]  }
 0x136   : > { %v519_v26 = vmul.f32 1.442695, %v517_v24  ;;  %1513 = vmatpush3.bf16.msra.mxu0 %v1668_v20  ;;  %v1672_v24 = vld [vmem:[#allocation5 + $0x68] sm:$0xff]  }
 0x137   : > { %1683 = vpow2.f32 %v521_v25  ;;  %1514 = vmatprep.subr.bf16.mxu0 %v1866_v19  ;;  %v1673_v25 = vld [vmem:[#allocation5 + $0x70] sm:$0xff]  }
 0x138   : > { %1685 = vpow2.f32 %v519_v26  ;;  %v1674_v26 = vld [vmem:[#allocation5 + $0x78] sm:$0xff]  }
 0x13a   : > { %1515 = vmatpush3.bf16.msra.mxu0 %v1669_v21 }
 0x13b   : > { %1516 = vmatprep.subr.bf16.mxu0 %v1866_v19 }
 0x13e   : > { %1517 = vmatpush3.bf16.msra.mxu0 %v1670_v22 }
 0x13f   : > { %1518 = vmatprep.subr.bf16.mxu0 %v1866_v19 }
 0x141   : > { %v1684_v27 = vpop.eup %1683 }
 0x142   : > { %v1686_v28 = vpop.eup %1685  ;;  %1519 = vmatpush3.bf16.msra.mxu0 %v1671_v23 }
 0x143   : > { %v523_v30 = vpack.c.bf16 %v1684_v27, %v1686_v28  ;;  %1520 = vmatprep.subr.bf16.mxu0 %v1866_v19 }
 0x145   : > { %1377 = vmatmul.mubr.msk.bf16.vlgmr.msra.gmra.mrb[0].mxu1 %vm548_vm1, %v523_v30 }
 0x146   : > { %1444 = vmatpush3.bf16.msra.mxu1 %v1636_v29  ;;  %1521 = vmatpush3.bf16.msra.mxu0 %v1672_v24 }
 0x147   : > { %1445 = vmatprep.subr.bf16.mxu1 %v1637_v31  ;;  %1522 = vmatprep.subr.bf16.mxu0 %v1866_v19 }
 0x14a   : > { %1446 = vmatpush3.bf16.msra.mxu1 %v1638_v32  ;;  %1523 = vmatpush3.bf16.msra.mxu0 %v1673_v25 }
 0x14b   : > { %1447 = vmatprep.subr.bf16.mxu1 %v1639_v33  ;;  %1524 = vmatprep.subr.bf16.mxu0 %v1866_v19 }
 0x14e   : > { %1448 = vmatpush3.bf16.msra.mxu1 %v1640_v34  ;;  %1525 = vmatpush3.bf16.msra.mxu0 %v1674_v26  ;;  %v1395_v34 = vld [vmem:[%s2194_s7 + $0x1] ss:$0 sm:$0xff] }
 0x14f   : > { %1449 = vmatprep.subr.bf16.mxu1 %v1641_v35  ;;  %1530 = vmatprep.subr.bf16.mxu0 %v1866_v19 }
 0x152   : > { %1450 = vmatpush3.bf16.msra.mxu1 %v1642_v36 }
 0x153   : > { %1451 = vmatprep.subr.bf16.mxu1 %v1643_v37 }
 0x156   : > { %1452 = vmatpush3.bf16.msra.mxu1 %v1644_v38 }
 0x157   : > { %1453 = vmatprep.subr.bf16.mxu1 %v1645_v39 }
 0x15a   : > { %1454 = vmatpush3.bf16.msra.mxu1 %v1646_v40 }
 0x15b   : > { %1455 = vmatprep.subr.bf16.mxu1 %v1647_v41 }
 0x15e   : > { %1456 = vmatpush3.bf16.msra.mxu1 %v1648_v42 }
 0x15f   : > { %1457 = vmatprep.subr.bf16.mxu1 %v1649_v43 }
 0x162   : > { %1458 = vmatpush3.bf16.msra.mxu1 %v1650_v44 }
 0x163   : > { %1465 = vmatprep.subr.bf16.mxu1 %v1651_v45 }
 0x218   : > { %v586_v53 = vpop.f32.mrb[0].mxu1 }
 0x219   : > { %v587_v54 = vadd.f32 %v586_v53, %v531_v51  ;;  %v588_v55 = vpop.f32.mrb[1].mxu1 }
 0x21a   : > { %v589_v56 = vadd.f32 %v588_v55, %v535_v52  ;;  %v590_v57 = vpop.f32.mrb[2].mxu1  ;;  %v1679_v55 = vld [vmem:[#allocation5 + $0x20] sm:$0xff]  }
 0x21b   : > { %v591_v58 = vadd.f32 %v590_v57, %v531_v51  ;;  %v592_v59 = vpop.f32.mrb[3].mxu1  ;;  %v595_v61 = vmax.f32 %v587_v54, 0.0  ;;  %v1680_v57 = vld [vmem:[#allocation5 + $0x28] sm:$0xff]  }
 0x21c   : > { %v593_v60 = vadd.f32 %v592_v59, %v535_v52  ;;  %v596_v63 = vmax.f32 %v589_v56, 0.0  ;;  %v1678_v52 = vld [vmem:[#allocation5 + $0x18] sm:$0xff]  }
 0x21d   : > { %v597_v62 = vmax.f32 %v591_v58, 0.0  ;;  %v1681_v58 = vld [vmem:[#allocation5 + $0x30] sm:$0xff]   ;;  %v1682_v59 = vld [vmem:[#allocation5 + $0x38] sm:$0xff]  }
 0x21e   : > { %v598_v0 = vmax.f32 %v593_v60, 0.0 }
 0x21f   : > { %v599_v1 = vpack.c.bf16 %v597_v62, %v595_v61 }
 0x220   : > { %v600_v2 = vpack.c.bf16 %v598_v0, %v596_v63 }
 0x222   : > { %768 = vmatprep.mubr.bf16.mxu1 %v600_v2 }
 0x223   : > { %769 = vmatmul.mubr.bf16.vlgmr.msra.gmra.mrb[4].mxu1 %v599_v1 }
 0x224   : > { %1466 = vmatpush3.bf16.msra.mxu1 %v1652_v3  ;;  %967 = vmatprep.mubr.bf16.mxu1 %v600_v2 }
 0x225   : > { %1467 = vmatprep.subr.bf16.mxu1 %v1653_v4 }
 0x228   : > { %1468 = vmatpush3.bf16.msra.mxu1 %v1654_v5 }
 0x229   : > { %1469 = vmatprep.subr.bf16.mxu1 %v1655_v6 }
 0x22c   : > { %1470 = vmatpush3.bf16.msra.mxu1 %v1656_v7 }
 0x22d   : > { %1471 = vmatprep.subr.bf16.mxu1 %v1657_v8 }
 0x230   : > { %1472 = vmatpush3.bf16.msra.mxu1 %v1658_v9 }
 0x231   : > { %1473 = vmatprep.subr.bf16.mxu1 %v1659_v10 }
 0x234   : > { %1474 = vmatpush3.bf16.msra.mxu1 %v1660_v11 }
 0x235   : > { %1475 = vmatprep.subr.bf16.mxu1 %v1661_v12 }
 0x238   : > { %1476 = vmatpush3.bf16.msra.mxu1 %v1662_v13 }
 0x239   : > { %1477 = vmatprep.subr.bf16.mxu1 %v1663_v14 }
 0x23c   : > { %1478 = vmatpush3.bf16.msra.mxu1 %v1664_v15 }
 0x23d   : > { %1479 = vmatprep.subr.bf16.mxu1 %v1665_v16 }
 0x240   : > { %1480 = vmatpush3.bf16.msra.mxu1 %v1666_v17 }
 0x243   : > { %968 = vmatmul.mubr.bf16.vlgmr.msra.gmra.mrb[8].mxu1 %v599_v1 }
 0x2f6   : > { %v1459_v27 = vpop.f32.mrb[4].mxu1 }
 0x2f7   : > { %v1460_v28 = vpop.f32.mrb[5].mxu1 }
 0x2f8   : > { %v1461_v29 = vadd.f32 %v1460_v28, %v1459_v27  ;;  %v1462_v30 = vpop.f32.mrb[6].mxu1 }
 0x2f9   : > { %v1463_v31 = vpop.f32.mrb[7].mxu1 }
 0x2fa   : > { %v1464_v32 = vadd.f32 %v1463_v31, %v1462_v30  ;;  %v771_v53 = vadd.f32 %v1461_v29, %v1378_v50 }
 0x2fc   : > { %v774_v51 = vadd.f32 %v1464_v32, %v1378_v50  ;;  %v777_v56 = vmul.f32 1.442695, %v771_v53 }
 0x2fe   : > { %v779_v54 = vmul.f32 1.442695, %v774_v51 }
 0x316   : > { %v1481_v33 = vpop.f32.mrb[8].mxu1 }
 0x317   : > { %v1482_v35 = vpop.f32.mrb[9].mxu1 }
 0x318   : > { %v1483_v36 = vadd.f32 %v1482_v35, %v1481_v33  ;;  %v1484_v37 = vpop.f32.mrb[10].mxu1 }
 0x319   : > { %v1485_v38 = vpop.f32.mrb[11].mxu1 }
 0x31a   : > { %v970_v39 = vadd.f32 %v1483_v36, %v1395_v34  ;;  %v1486_v40 = vadd.f32 %v1485_v38, %v1484_v37 }
 0x31c   : > { %v976_v41 = vmul.f32 1.442695, %v970_v39  ;;  %v973_v42 = vadd.f32 %v1486_v40, %v1395_v34 }
 0x31e   : > { %v978_v43 = vmul.f32 1.442695, %v973_v42  ;;  %1687 = vpow2.f32 %v976_v41 }
 0x320   : > { %1689 = vpow2.f32 %v978_v43 }
 0x321   : > { %1691 = vpow2.f32 %v779_v54 }
 0x322   : > { %1693 = vpow2.f32 %v777_v56 }
 0x328   : > { %v1688_v44 = vpop.eup %1687 }
 0x32a   : > { %v2085_v45 = vpop.eup %1689 }
 0x32b   : > { %v980_v47 = vpack.c.bf16 %v2085_v45, %v1688_v44  ;;  %v1692_v60 = vpop.eup %1691 }
 0x32c   : > { %v1694_v61 = vpop.eup %1693 }
 0x32d   : > { %1527 = vmatmul.mubr.bf16.vlgmr.msra.gmra.mrb[4].mxu0 %v980_v47  ;;  %v781_v62 = vpack.c.bf16 %v1692_v60, %v1694_v61 }
 0x32e   : > { %1531 = vmatpush3.bf16.msra.mxu0 %v1675_v46  ;;  %1546 = vmatprep.mubr.msk.bf16.mxu0 %vm1867_vm2, %v1866_v19 }
 0x32f   : > { %1532 = vmatprep.subr.bf16.mxu0 %v1866_v19 }
 0x332   : > { %1533 = vmatpush3.bf16.msra.mxu0 %v1676_v48 }
 0x333   : > { %1534 = vmatprep.subr.bf16.mxu0 %v1866_v19 }
 0x336   : > { %1535 = vmatpush3.bf16.msra.mxu0 %v1677_v49 }
 0x337   : > { %1536 = vmatprep.subr.bf16.mxu0 %v1866_v19 }
 0x33a   : > { %1537 = vmatpush3.bf16.msra.mxu0 %v1678_v52 }
 0x33b   : > { %1538 = vmatprep.subr.bf16.mxu0 %v1866_v19 }
 0x33e   : > { %1539 = vmatpush3.bf16.msra.mxu0 %v1679_v55 }
 0x33f   : > { %1540 = vmatprep.subr.bf16.mxu0 %v1866_v19 }
 0x342   : > { %1541 = vmatpush3.bf16.msra.mxu0 %v1680_v57 }
 0x343   : > { %1542 = vmatprep.subr.bf16.mxu0 %v1866_v19 }
 0x346   : > { %1543 = vmatpush3.bf16.msra.mxu0 %v1681_v58 }
 0x347   : > { %1544 = vmatprep.subr.bf16.mxu0 %v1866_v19 }
 0x34a   : > { %1545 = vmatpush3.bf16.msra.mxu0 %v1682_v59 }
 0x34d   : > { %1547 = vmatmul.mubr.bf16.vlgmr.msra.gmra.mrb[4].mxu0 %v781_v62 }
 0x420   : > { %v1168_v63 = vpop.f32.mrb[4].mxu0 }
 0x421   : > { %1695 = vrcp.f32 %v1168_v63  ;;  %v1548_v0 = vpop.f32.mrb[5].mxu0 }
 0x422   : > { %v1171_v1 = vpop.f32.mrb[6].mxu0 }
 0x423   : > { %v1549_v2 = vpop.f32.mrb[7].mxu0  ;;  %1697 = vrcp.f32 %v1171_v1 }
 0x42b   : > { %v1696_v3 = vpop.eup %1695 }
 0x42c   : > { %1187 = vperm.xlu1 %1630, %v1696_v3  }
 0x42d   : > { %v1698_v4 = vpop.eup %1697 }
 0x430   : > { %1192 = vperm.xlu1 %1630, %v1698_v4  }
 0x4ab   : > { %v1188_v5 = vpop.permute.xlu1 %1187 }
 0x4ac   : > { %v1195_v6 = vmul.f32 %v1694_v61, %v1188_v5  ;;  %v1196_v7 = vmul.f32 %v1688_v44, %v1188_v5  ;;  %v1203_v8 = vmul.f32 %v1188_v5, %v1168_v63 }
 0x4ae   : > { %1199 = vst [vmem:[%s387_s19] sm:$0xff] %v1195_v6  ;;  %1200 = vst [vmem:[%s387_s19 + $0x8] sm:$0xff] %v1196_v7 }
 0x4af   : > { %1205 = vst [vmem:[%s394_s29] sm:$0xff] %v1203_v8  ;;  %v1193_v9 = vpop.permute.xlu1 %1192 }
 0x4b0   : > { %v1197_v10 = vmul.f32 %v1692_v60, %v1193_v9  ;;  %v1198_v11 = vmul.f32 %v2085_v45, %v1193_v9  ;;  %v1204_v12 = vmul.f32 %v1193_v9, %v1171_v1 }
 0x4b2   : > { %1201 = vst [vmem:[%s387_s19 + $0x10] sm:$0xff] %v1197_v10  ;;  %1202 = vst [vmem:[%s387_s19 + $0x18] sm:$0xff] %v1198_v11 }
 0x4b3   : > { %1206 = vst [vmem:[%s394_s29 + $0x8] sm:$0xff] %v1204_v12 }
 0x4b4   : > { %1768 = shalt.err (!%p1765_p11)
}
 0x4b5   : > { %s1769_s29 = scalar_lea.hbm %s2112_s25, 512  ;;  %s1773_s30 = scalar_lea.hbm %s2196_s9, 1536 }
 0x4b6   : > { %p1770_p13 = scmp.ne.s32.totalorder %s2112_s25, %s1769_s29  ;;  %p1774_p6 = scmp.lt.u32.totalorder %s2112_s25, %s2196_s9 }
 0x4b7   : > { %p1775_p9 = scmp.lt.u32.totalorder %s1773_s30, %s1769_s29  ;;  %p1777_p12 = scmp.lt.u32.totalorder %s1769_s29, %s2112_s25 }
 0x4b8   : > { %p1771_p0 = pnand %p1770_p13, %p2218_p1 }
 0x4b9   : > { %p1776_p10 = por %p1775_p9, %p1774_p6 }
 0x4ba   : > { %p1772_p5 = pneg %p1771_p0 }
 0x4bb   : > { %p1778_p2 = por %p1777_p12, %p1776_p10 }
 0x4bd   : > { %p1779_p3 = pnand %p1778_p2, %p1772_p5 }
 0x4bf   : > { %1782 = shalt.err (!%p1779_p3)
}
 0x4c0   : > { %s1869_s21 = smov 256   ;;  %s1870_s26 = smov 16  }
 0x4c1   : > { %1562 = dma.vmem_to_hbm [thread:$0]  (%p2218_p1), %s2114_s24, 512, %s2112_s25, %s1208_s18, %s1869_s21, %s1869_s21, %s1870_s26  }
 0x4c2   : > { %s1213_s15 = scalar_lea.sflag [#allocation9], %s2101_s20  ;;  %s1783_s28 = scalar_lea.vmem %s2106_s27, 256 }
 0x4c3   : > { %p1784_p4 = scmp.ne.s32.totalorder %s2106_s27, %s1783_s28  ;;  %s1871_s29 = smov [#allocation8]  }
 0x4c4   : > { %s1787_s19 = sshll.u32 %s1871_s29, 4  ;;  %s1788_s19 = int_to_ptr.vmem [resolvable:$false] %s1787_s19 }
 0x4c5   : > { %p1785_p7 = pnand %p1784_p4, %p2218_p1  ;;  %s1789_s11 = scalar_lea.vmem %s1788_s19, 512 }
 0x4c6   : > { %p1790_p11 = scmp.lt.s32.totalorder %s2106_s27, %s1788_s19  ;;  %p1791_p13 = scmp.lt.s32.totalorder %s1789_s11, %s1783_s28 }
 0x4c7   : > { %p1786_p8 = pneg %p1785_p7 }
 0x4c8   : > { %p1792_p0 = por %p1791_p13, %p1790_p11 }
 0x4ca   : > { %p1793_p5 = pnand %p1792_p0, %p1786_p8 }
 0x4cc   : > { %1796 = shalt.err (!%p1793_p5)
}
 0x4cd   : > { %s1797_s24 = scalar_lea.hbm %s2120_s22, 256  ;;  %s1801_s30 = scalar_lea.hbm %s2197_s10, 768 }
 0x4ce   : > { %p1798_p6 = scmp.ne.s32.totalorder %s2120_s22, %s1797_s24  ;;  %p1802_p12 = scmp.lt.u32.totalorder %s2120_s22, %s2197_s10 }
 0x4cf   : > { %p1803_p2 = scmp.lt.u32.totalorder %s1801_s30, %s1797_s24  ;;  %p1805_p4 = scmp.lt.u32.totalorder %s1797_s24, %s2120_s22 }
 0x4d0   : > { %p1799_p9 = pnand %p1798_p6, %p2218_p1 }
 0x4d1   : > { %p1804_p3 = por %p1803_p2, %p1802_p12 }
 0x4d2   : > { %p1800_p10 = pneg %p1799_p9 }
 0x4d3   : > { %p1806_p7 = por %p1805_p4, %p1804_p3 }
 0x4d5   : > { %p1807_p8 = pnand %p1806_p7, %p1800_p10 }
 0x4d7   : > { %1810 = shalt.err (!%p1807_p8)
}
 0x4d8   : > { %s1872_s21 = smov 128   ;;  %s1873_s26 = smov 8  }
 0x4d9   : > { %1563 = dma.vmem_to_hbm [thread:$0]  (%p2218_p1), %s2106_s27, 256, %s2120_s22, %s1213_s15, %s1872_s21, %s1872_s21, %s1873_s26  }
 0x4da PF: > { %s2219_s28 = sld [smem:[#allocation17_spill]]  ;;  %p1584_p11 = scmp.ge.s32.totalorder %s1857_s16, 2 }
 0x4db   : > { %s1258_s29 = sand.u32 1, %s1845_s13  }
 0x4dc   : > { %s1259_s19 = scalar_lea.sflag [#allocation4], %s1258_s29 }
 0x4e0   : > { %p2220_p13 = scmp.ne.s32.totalorder %s2219_s28, 0 }
 0x4e2   : > { %p1574_p0 = pnand %p1584_p11, %p2220_p13 }
 0x4e4   : > { %1836 = dma.done.wait (!%p1574_p0), %s1259_s19, 512  }
 0x4e5   : > { %1838 = vsyncadd (!%p1574_p0), %s1259_s19, 4294966784  ;;  %s1268_s11 = scalar_lea.sflag [#allocation9], %s1258_s29 }
 0x4e6   : > { %1840 = dma.done.wait (!%p1574_p0), %s1268_s11, 256  }
 0x4e7   : > { %1842 = vsyncadd (!%p1574_p0), %s1268_s11, 4294967040  ;;  %s2221_s16 = sld [smem:[#allocation15_spill]]  ;;  %s2222_s24 = sld [smem:[#allocation14_spill]] }
 0x4e8   : > { %s2223_s15 = sld [smem:[#allocation16_spill]]  ;;  %s2224_s13 = smov %s1849_s14 }
 0x4ed   : > { %p26_p1 = scmp.ge.s32.totalorder %s2221_s16, 5   ;;  %s2225_s14 = smov %s2222_s24 }
 0x4ef   :  { %28 = sbr.rel (!%p26_p1) target bundleno = 7 (0x7), region = 117 }
 0x4f6   :  { %1273 = vsyncpa [#allocation3], 1 }
 0x4f7   :  { %1275 = vsyncpa [#allocation3 + $0x1], 1 }
 0x4f8   :  { %1276 = vsyncpa [#allocation6], 1 }
 0x4f9   :  { %1277 = vsyncpa [#allocation4], 1 }
 0x4fa   :  { %1279 = vsyncpa [#allocation4 + $0x1], 1 }
 0x4fb   :  { %1280 = vsyncpa [#allocation9], 1 }
 0x4fc   :  { %1282 = vsyncpa [#allocation9 + $0x1], 1 }

// kernel: tpu_custom_call.1
= control target key start
LH: loop header
LB: loop body
LE: loop exit
PB: predicated region body
PF: predicated region fallthrough
CT: control target
= control target key end

     0   :  { %16 = vsyncpa [#allocation3], 0  ;;  %s2187_s0 = inlined_call_operand.vmem [shape: f32[48,8], index: 0, kind: input, shape index: {}]   ;;  %s2188_s1 = inlined_call_operand.vmem [shape: f32[8,16], index: 1, kind: input, shape index: {}]   ;;  %s2189_s2 = inlined_call_operand.vmem [shape: f32[1,16], index: 2, kind: input, shape index: {}]   ;;  %s2190_s3 = inlined_call_operand.vmem [shape: f32[1,16], index: 3, kind: input, shape index: {}]   ;;  %s2191_s4 = inlined_call_operand.vmem [shape: bf16[16,256], index: 4, kind: input, shape index: {}]   ;;  %s2192_s5 = inlined_call_operand.vmem [shape: f32[1,256], index: 5, kind: input, shape index: {}]   ;;  %s2193_s6 = inlined_call_operand.hbm [shape: bf16[256,256], index: 6, kind: input, shape index: {}]   ;;  %s2194_s7 = inlined_call_operand.vmem [shape: f32[1,256], index: 7, kind: input, shape index: {}]   ;;  %s2195_s8 = inlined_call_operand.hbm [shape: bf16[256,128], index: 8, kind: input, shape index: {}]   ;;  %s2196_s9 = inlined_call_operand.hbm [shape: f32[48,256], index: 9, kind: output, shape index: {0}]   ;;  %s2197_s10 = inlined_call_operand.hbm [shape: f32[48,128], index: 10, kind: output, shape index: {1}]  }
   0x1   :  { %17 = vsyncpa [#allocation6], 0 }
   0x2   :  { %18 = vsyncpa [#allocation4], 0 }
   0x3   :  { %20 = vsyncpa [#allocation4 + $0x1], 0 }
   0x4   :  { %21 = vsyncpa [#allocation9], 0 }
   0x5   :  { %23 = vsyncpa [#allocation9 + $0x1], 0  ;;  %s1929_s13 = smov 0   ;;  %s1931_s14 = smov 0  }
   0x6   :  { %s1933_s15 = smov 0   ;;  %s1935_s16 = smov 0  }
   0x7 LB: > { %2205 = sst [smem:[#allocation14_spill]] %s1853_s15  ;;  %s1950_s17 = sadd.s32 4294967295, %s1857_s16   ;;  %s1857_s16 = sphi %s1935_s16, %s2221_s16   ;;  %s1853_s15 = sphi %s1933_s15, %s2223_s15   ;;  %s1849_s14 = sphi %s1931_s14, %s2225_s14   ;;  %s1845_s13 = sphi %s1929_s13, %s2224_s13  }
   0x8   : > { %s1359_s18 = sadd.s32 4294967294, %s1857_s16   ;;  %s1954_s19 = sadd.s32 1, %s1857_s16  }
   0x9   : > { %2206 = sst [smem:[#allocation15_spill]] %s1954_s19  ;;  %s230_s20 = sadd.s32 1, %s1853_s15 }
   0xa   : > { %s227_s21 = ssub.s32 %s1857_s16, %s1954_s19  ;;  %p240_p0 = scmp.ne.s32.totalorder %s1853_s15, %s1849_s14 }
   0xb   : > { %p228_p1 = scmp.eq.s32.totalorder %s227_s21, 0  ;;  %p241_p2 = scmp.eq.s32.totalorder %s1950_s17, 2 }
   0xc   : > { %p246_p3 = scmp.ne.s32.totalorder %s1849_s14, %s1845_s13  ;;  %p247_p4 = scmp.eq.s32.totalorder %s1359_s18, 2 }
   0xd   : > { %s1965_s22 = scalar_select %p228_p1, %s1853_s15, %s230_s20  }
   0xe   : > { %p1967_p5 = por %p241_p2, %p240_p0  ;;  %p1971_p6 = por %p247_p4, %p246_p3 }
   0xf   : > { %2207 = sst [smem:[#allocation16_spill]] %s1965_s22  ;;  %p1360_p7 = scmp.ge.s32.totalorder %s1857_s16, 1 }
  0x10   : > { %s2208_s23 = scalar_select %p1967_p5, 1, 0 }
  0x11   : > { %s2209_s24 = scalar_select %p1971_p6, 1, 0 }
  0x12   : > { %p280_p8 = scmp.lt.s32.totalorder %s1857_s16, 4  ;;  %p2198_p9 = scmp.eq.s32.totalorder %s1950_s17, 0 }
  0x13   : > { %2210 = sst [smem:[#allocation17_spill]] %s2209_s24  ;;  %s1859_s26 = smov [#allocation2]  }
  0x14   : > { %p1978_p10 = pnand %p1360_p7, %p280_p8  ;;  %s307_s27 = sshll.u32 %s1859_s26, 4  ;;  %s308_s27 = int_to_ptr.vmem [resolvable:$true] %s307_s27 }
  0x15   : > { %s1860_s29 = smov [#allocation5]   ;;  %s1699_s18 = scalar_lea.hbm %s2193_s6, 4096 }
  0x16   : > { %s2211_s25 = scalar_select %p1978_p10, 1, 0 }
  0x17   : > { %p1566_p11 = pneg %p1978_p10  ;;  %s323_s30 = sshll.u32 %s1860_s29, 4  ;;  %s1990_s30 = int_to_ptr.vmem [resolvable:$true] %s323_s30 }
  0x18   : > { %p1700_p13 = scmp.ne.s32.totalorder %s2193_s6, %s1699_s18  ;;  %p1706_p3 = scmp.lt.u32.totalorder %s1699_s18, %s2193_s6 }
  0x19   : > { %p1986_p12 = pnand %p2198_p9, %p1566_p11 }
  0x1b   : > { %p1701_p0 = pneg %p1986_p12 }
  0x1d   : > { %p1702_p1 = pnand %p1701_p0, %p1700_p13 }
  0x1f   : > { %p1703_p2 = pneg %p1702_p1 }
  0x21   : > { %p1708_p4 = pnand %p1706_p3, %p1703_p2 }
  0x23   : > { %1711 = shalt.err (!%p1708_p4)
}
  0x24   : > { %s1712_s29 = scalar_lea.vmem %s308_s27, 4096  ;;  %p1720_p9 = scmp.lt.s32.totalorder %s308_s27, %s308_s27 }
  0x25   : > { %p1713_p7 = scmp.ne.s32.totalorder %s308_s27, %s1712_s29  ;;  %p1721_p6 = scmp.lt.s32.totalorder %s1712_s29, %s1712_s29 }
  0x27   : > { %p1715_p8 = pnand %p1713_p7, %p1701_p0  ;;  %p1722_p5 = por %p1721_p6, %p1720_p9 }
  0x29   : > { %p1716_p11 = pneg %p1715_p8 }
  0x2b   : > { %p1723_p10 = pnand %p1722_p5, %p1716_p11 }
  0x2d   : > { %1726 = shalt.err (!%p1723_p10)
}
  0x2e   : > { %s1861_s11 = smov 128   ;;  %s1862_s12 = smov 8  }
  0x2f   : > { %1569 = dma.hbm_to_vmem [thread:$0]  (!%p1986_p12), %s2193_s6, 4096, %s308_s27, [#allocation3], %s1861_s11, %s1861_s11, %s1862_s12  }
  0x30   : > { %s1727_s26 = scalar_lea.hbm %s2195_s8, 2048 }
  0x31   : > { %p1728_p13 = scmp.ne.s32.totalorder %s2195_s8, %s1727_s26  ;;  %p1734_p9 = scmp.lt.u32.totalorder %s1727_s26, %s2195_s8 }
  0x33   : > { %p1730_p5 = pnand %p1728_p13, %p1701_p0 }
  0x35   : > { %p1731_p6 = pneg %p1730_p5 }
  0x37   : > { %p1736_p10 = pnand %p1734_p9, %p1731_p6 }
  0x39   : > { %1739 = shalt.err (!%p1736_p10)
}
  0x3a   : > { %s1740_s27 = scalar_lea.vmem %s1990_s30, 2048  ;;  %p1748_p4 = scmp.lt.s32.totalorder %s1990_s30, %s1990_s30 }
  0x3b   : > { %p1741_p1 = scmp.ne.s32.totalorder %s1990_s30, %s1740_s27  ;;  %p1749_p7 = scmp.lt.s32.totalorder %s1740_s27, %s1740_s27 }
  0x3d   : > { %p1743_p2 = pnand %p1741_p1, %p1701_p0  ;;  %p1750_p8 = por %p1749_p7, %p1748_p4 }
  0x3f   : > { %p1744_p3 = pneg %p1743_p2 }
  0x41   : > { %p1751_p11 = pnand %p1750_p8, %p1744_p3 }
  0x43   : > { %1754 = shalt.err (!%p1751_p11)
}
  0x44   : > { %s1863_s15 = smov 64   ;;  %s1864_s19 = smov 4  }
  0x45   : > { %1572 = dma.hbm_to_vmem [thread:$0]  (!%p1986_p12), %s2195_s8, 2048, %s1990_s30, [#allocation6], %s1863_s15, %s1863_s15, %s1864_s19  }
  0x46   : > { %p2213_p13 = scmp.ne.s32.totalorder %s2211_s25, 0 }
  0x47   : > { %p2214_p0 = scmp.eq.s32.totalorder (!%p2213_p13), %s1950_s17, 0 }
  0x48   : > { %348 = sbr.rel (%p2213_p13) target bundleno = 1242 (0x4da), region = 56 }
  0x4f   : > { %1828 = dma.done.wait (%p2214_p0), [#allocation3], 4096   ;;  %p2215_p5 = pmov %p2214_p0 }
  0x50   : > { %p2216_p6 = pmov %p2214_p0 }
  0x51   : > { %1830 = vsyncadd (%p2215_p5), [#allocation3], 4294963200 }
  0x52   : > { %1832 = dma.done.wait (%p2216_p6), [#allocation6], 2048   ;;  %p2217_p9 = pmov %p2214_p0 }
  0x53   : > { %s1369_s28 = sshll.u32 %s1950_s17, 1  ;;  %vm408_vm0 = vcmask 64512   ;;  %v415_v0 = vld [vmem:[%s2188_s1] sm:$0xff]  ;;  %v1865_v9 = vmov 0   ;;  %vm548_vm1 = vcmask 130048   ;;  %v528_v46 = vlaneseq  ;;  %s2101_s20 = sand.u32 1, %s1849_s14  }
  0x54   : > { %1834 = vsyncadd (%p2217_p9), [#allocation6], 4294965248  ;;  %p396_p10 = scmp.lt.s32.totalorder %s1369_s28, 5  ;;  %1505 = vmatprep.subr.mxu0 %v415_v0  ;;  %v1632_v7 = vld [vmem:[%s2191_s4 + $0x4] ss:$8 sps:$4 sm:$0xff]   ;;  %584 = vmatprep.mubr.bf16.mxu1 %v1865_v9  ;;  %vm1867_vm2 = vmmov 0  }
  0x55   : > { %1506 = vmatpush3.msra.mxu0 %v415_v0  ;;  %v1634_v8 = vld [vmem:[%s2191_s4] ss:$8 sps:$4 sm:$0xff]   ;;  %1630 = vset.pattern.permute.xlu1 %v1865_v9  ;;  %v1637_v31 = vld [vmem:[#allocation2 + $0x90] ss:$8 sps:$4 sm:$0xff]   ;;  %v1651_v45 = vld [vmem:[#allocation2 + $0x84] ss:$8 sps:$4 sm:$0xff]  }
  0x56   : > { %s2227_s28 = smov (!%p396_p10, %s1369_s28), 5  ;;  %552 = vmatprep.subr.bf16.mxu1 %v1632_v7  ;;  %1631 = vset.pattern.permute.xlu0 %v1865_v9  ;;  %v1635_v10 = vld [vmem:[#allocation2 + $0x80] ss:$8 sps:$4 sm:$0xff]   ;;  %v1638_v32 = vld [vmem:[#allocation2 + $0x10] ss:$8 sps:$4 sm:$0xff]   ;;  %v529_v47 = vshrl.u32 %v528_v46, 7 }
  0x57   : > { %s1370_s30 = sshll.u32 %s2227_s28, 3  ;;  %553 = vmatpush1.bf16.msra.mxu1 %v1634_v8  ;;  %v1373_v13 = vld [vmem:[%s2189_s2] ss:$0 sm:$0xff]  ;;  %v1641_v35 = vld [vmem:[#allocation2 + $0xb0] ss:$8 sps:$4 sm:$0xff]   ;;  %s1368_s21 = sshll.u32 %s2101_s20, 4 }
  0x58   : > { %s399_s22 = scalar_lea.vmem %s2187_s0, %s1370_s30  ;;  %1443 = vmatprep.subr.bf16.mxu1 %v1635_v10  ;;  %v1374_v17 = vld [vmem:[%s2190_s3] ss:$0 sm:$0xff]  ;;  %v1642_v36 = vld [vmem:[#allocation2 + $0x30] ss:$8 sps:$4 sm:$0xff]   ;;  %v530_v48 = vsub.s32 0, %v529_v47  ;;  %v534_v50 = vsub.s32 1, %v529_v47 }
  0x59   : > { %v404_v1 = vld [vmem:[%s399_s22] sm:$0xff]  ;;  %v405_v2 = vld [vmem:[%s399_s22 + $0x8] sm:$0xff]  ;;  %v1645_v39 = vld [vmem:[#allocation2 + $0xd0] ss:$8 sps:$4 sm:$0xff]   ;;  %s1367_s26 = sshll.u32 %s2101_s20, 5  ;;  %s394_s29 = scalar_lea.vmem [#allocation8], %s1368_s21 }
  0x5a   : > { %v406_v3 = vmul.f32 %v404_v1, %v404_v1  ;;  %1507 = vmatprep.mubr.msk.f32.mxu0 %vm408_vm0, %v404_v1  ;;  %v407_v4 = vmul.f32 %v405_v2, %v405_v2  ;;  %v1636_v29 = vld [vmem:[#allocation2] ss:$8 sps:$4 sm:$0xff]   ;;  %v1646_v40 = vld [vmem:[#allocation2 + $0x50] ss:$8 sps:$4 sm:$0xff]   ;;  %v1656_v7 = vld [vmem:[#allocation2 + $0x24] ss:$8 sps:$4 sm:$0xff]  }
  0x5b   : > { %1508 = vmatmul.mubr.msk.f32.vlgmr.msra.gmra.mrb[0].mxu0 %vm408_vm0, %v405_v2  ;;  %v1639_v33 = vld [vmem:[#allocation2 + $0xa0] ss:$8 sps:$4 sm:$0xff]   ;;  %v1649_v43 = vld [vmem:[#allocation2 + $0xf0] ss:$8 sps:$4 sm:$0xff]   ;;  %v1657_v8 = vld [vmem:[#allocation2 + $0xb4] ss:$8 sps:$4 sm:$0xff]  }
  0x5c   : > { %v409_v5 = vsel %vm408_vm0, %v406_v3, 0.0  ;;  %v412_v6 = vsel %vm408_vm0, %v407_v4, 0.0  ;;  %v1640_v34 = vld [vmem:[#allocation2 + $0x20] ss:$8 sps:$4 sm:$0xff]   ;;  %v1650_v44 = vld [vmem:[#allocation2 + $0x70] ss:$8 sps:$4 sm:$0xff]  }
  0x5d   : > { %410 = vadd.xlane.f32.xlu0 %v409_v5  ;;  %v1643_v37 = vld [vmem:[#allocation2 + $0xc0] ss:$8 sps:$4 sm:$0xff]   ;;  %v1652_v3 = vld [vmem:[#allocation2 + $0x4] ss:$8 sps:$4 sm:$0xff]   ;;  %v1653_v4 = vld [vmem:[#allocation2 + $0x94] ss:$8 sps:$4 sm:$0xff]  }
  0x5e   : > { %v1644_v38 = vld [vmem:[#allocation2 + $0x40] ss:$8 sps:$4 sm:$0xff]   ;;  %v1654_v5 = vld [vmem:[#allocation2 + $0x14] ss:$8 sps:$4 sm:$0xff]   ;;  %v1659_v10 = vld [vmem:[#allocation2 + $0xc4] ss:$8 sps:$4 sm:$0xff]  }
  0x5f   : > { %v1647_v41 = vld [vmem:[#allocation2 + $0xe0] ss:$8 sps:$4 sm:$0xff]   ;;  %v1658_v9 = vld [vmem:[#allocation2 + $0x34] ss:$8 sps:$4 sm:$0xff]   ;;  %s1243_s27 = sshll.u32 %s394_s29, 4  ;;  %s1438_s15 = sshll.u32 %s1950_s17, 9  ;;  %s2106_s27 = int_to_ptr.vmem [resolvable:$true] %s1243_s27 }
  0x60   : > { %v1648_v42 = vld [vmem:[#allocation2 + $0x60] ss:$8 sps:$4 sm:$0xff]   ;;  %s387_s19 = scalar_lea.vmem [#allocation7], %s1367_s26  ;;  %s1439_s11 = sshll.u32 %s1950_s17, 8 }
  0x61   : > { %413 = vadd.xlane.f32.xlu0 %v412_v6  ;;  %v526_v49 = vld [vmem:[%s2192_s5] sm:$0x3]  ;;  %v1655_v6 = vld [vmem:[#allocation2 + $0xa4] ss:$8 sps:$4 sm:$0xff]   ;;  %s1227_s24 = sshll.u32 %s387_s19, 4  ;;  %s2112_s25 = scalar_lea.hbm %s2196_s9, %s1438_s15  ;;  %s2114_s24 = int_to_ptr.vmem [resolvable:$true] %s1227_s24 }
  0x62   : > { %v531_v51 = vrot.slane %v526_v49, %v530_v48  ;;  %v535_v52 = vrot.slane %v526_v49, %v534_v50  ;;  %v1675_v46 = vld [vmem:[#allocation5] sm:$0xff]   ;;  %v1676_v48 = vld [vmem:[#allocation5 + $0x8] sm:$0xff]   ;;  %v1677_v49 = vld [vmem:[#allocation5 + $0x10] sm:$0xff]   ;;  %s2120_s22 = scalar_lea.hbm %s2197_s10, %s1439_s11  ;;  %s1208_s18 = scalar_lea.sflag [#allocation4], %s2101_s20 }
  0x63   : > { %v1378_v50 = vld [vmem:[%s2194_s7] ss:$0 sm:$0xff]  ;;  %s1755_s21 = scalar_lea.vmem %s2114_s24, 512  ;;  %p2218_p1 = scmp.ne.s32.totalorder %s2208_s23, 0 }
  0x64   : > { %p1756_p12 = scmp.ne.s32.totalorder %s2114_s24, %s1755_s21  ;;  %s1868_s26 = smov [#allocation7]  }
  0x65   : > { %s1759_s15 = sshll.u32 %s1868_s26, 4  ;;  %s1760_s15 = int_to_ptr.vmem [resolvable:$false] %s1759_s15 }
  0x66   : > { %p1757_p2 = pnand %p1756_p12, %p2218_p1  ;;  %s1761_s28 = scalar_lea.vmem %s1760_s15, 1024 }
  0x67   : > { %p1762_p4 = scmp.lt.s32.totalorder %s2114_s24, %s1760_s15  ;;  %p1763_p7 = scmp.lt.s32.totalorder %s1761_s28, %s1755_s21 }
  0x68   : > { %p1758_p3 = pneg %p1757_p2 }
  0x69   : > { %p1764_p8 = por %p1763_p7, %p1762_p4 }
  0x6b   : > { %p1765_p11 = pnand %p1764_p8, %p1758_p3 }
  0xea   : > { %v411_v11 = vpop.xlane.xlu0 %410 }
  0xeb   : > { %v504_v15 = vmul.f32 %v1373_v13, %v411_v11  ;;  %v1660_v11 = vld [vmem:[#allocation2 + $0x44] ss:$8 sps:$4 sm:$0xff]  }
  0xee   : > { %v414_v12 = vpop.xlane.xlu0 %413 }
  0xef   : > { %v505_v14 = vmul.f32 %v1373_v13, %v414_v12  ;;  %v1661_v12 = vld [vmem:[#allocation2 + $0xd4] ss:$8 sps:$4 sm:$0xff]  }
  0xf0   : > { %v1662_v13 = vld [vmem:[#allocation2 + $0x54] ss:$8 sps:$4 sm:$0xff]  }
 0x12e   : > { %v1509_v16 = vpop.f32.mrb[0].mxu0 }
 0x12f   : > { %v507_v18 = vsub.f32 %v1509_v16, %v505_v14  ;;  %v488_v19 = vpop.f32.mrb[1].mxu0  ;;  %v1663_v14 = vld [vmem:[#allocation2 + $0xe4] ss:$8 sps:$4 sm:$0xff]   ;;  %v1665_v16 = vld [vmem:[#allocation2 + $0xf4] ss:$8 sps:$4 sm:$0xff]  }
 0x130   : > { %v506_v20 = vsub.f32 %v488_v19, %v504_v15  ;;  %v1664_v15 = vld [vmem:[#allocation2 + $0x64] ss:$8 sps:$4 sm:$0xff]   ;;  %v1866_v19 = vmov 0.0  }
 0x131   : > { %v516_v21 = vadd.f32 %v1374_v17, %v507_v18  ;;  %v1667_v18 = vld [vmem:[#allocation5 + $0x40] sm:$0xff]   ;;  %1510 = vmatprep.subr.bf16.mxu0 %v1866_v19  ;;  %1526 = vmatprep.mubr.msk.bf16.mxu0 %vm1867_vm2, %v1866_v19 }
 0x132   : > { %v515_v22 = vadd.f32 %v1374_v17, %v506_v20  ;;  %v1666_v17 = vld [vmem:[#allocation2 + $0x74] ss:$8 sps:$4 sm:$0xff]   ;;  %1511 = vmatpush3.bf16.msra.mxu0 %v1667_v18  ;;  %v1668_v20 = vld [vmem:[#allocation5 + $0x48] sm:$0xff]  }
 0x133   : > { %v518_v23 = vmin.f32 %v516_v21, 0.0  ;;  %1512 = vmatprep.subr.bf16.mxu0 %v1866_v19  ;;  %v1669_v21 = vld [vmem:[#allocation5 + $0x50] sm:$0xff]  }
 0x134   : > { %v517_v24 = vmin.f32 %v515_v22, 0.0  ;;  %v1670_v22 = vld [vmem:[#allocation5 + $0x58] sm:$0xff]  }
 0x135   : > { %v521_v25 = vmul.f32 1.442695, %v518_v23  ;;  %v1671_v23 = vld [vmem:[#allocation5 + $0x60] sm:$0xff]  }
 0x136   : > { %v519_v26 = vmul.f32 1.442695, %v517_v24  ;;  %1513 = vmatpush3.bf16.msra.mxu0 %v1668_v20  ;;  %v1672_v24 = vld [vmem:[#allocation5 + $0x68] sm:$0xff]  }
 0x137   : > { %1683 = vpow2.f32 %v521_v25  ;;  %1514 = vmatprep.subr.bf16.mxu0 %v1866_v19  ;;  %v1673_v25 = vld [vmem:[#allocation5 + $0x70] sm:$0xff]  }
 0x138   : > { %1685 = vpow2.f32 %v519_v26  ;;  %v1674_v26 = vld [vmem:[#allocation5 + $0x78] sm:$0xff]  }
 0x13a   : > { %1515 = vmatpush3.bf16.msra.mxu0 %v1669_v21 }
 0x13b   : > { %1516 = vmatprep.subr.bf16.mxu0 %v1866_v19 }
 0x13e   : > { %1517 = vmatpush3.bf16.msra.mxu0 %v1670_v22 }
 0x13f   : > { %1518 = vmatprep.subr.bf16.mxu0 %v1866_v19 }
 0x141   : > { %v1684_v27 = vpop.eup %1683 }
 0x142   : > { %v1686_v28 = vpop.eup %1685  ;;  %1519 = vmatpush3.bf16.msra.mxu0 %v1671_v23 }
 0x143   : > { %v523_v30 = vpack.c.bf16 %v1684_v27, %v1686_v28  ;;  %1520 = vmatprep.subr.bf16.mxu0 %v1866_v19 }
 0x145   : > { %1377 = vmatmul.mubr.msk.bf16.vlgmr.msra.gmra.mrb[0].mxu1 %vm548_vm1, %v523_v30 }
 0x146   : > { %1444 = vmatpush3.bf16.msra.mxu1 %v1636_v29  ;;  %1521 = vmatpush3.bf16.msra.mxu0 %v1672_v24 }
 0x147   : > { %1445 = vmatprep.subr.bf16.mxu1 %v1637_v31  ;;  %1522 = vmatprep.subr.bf16.mxu0 %v1866_v19 }
 0x14a   : > { %1446 = vmatpush3.bf16.msra.mxu1 %v1638_v32  ;;  %1523 = vmatpush3.bf16.msra.mxu0 %v1673_v25 }
 0x14b   : > { %1447 = vmatprep.subr.bf16.mxu1 %v1639_v33  ;;  %1524 = vmatprep.subr.bf16.mxu0 %v1866_v19 }
 0x14e   : > { %1448 = vmatpush3.bf16.msra.mxu1 %v1640_v34  ;;  %1525 = vmatpush3.bf16.msra.mxu0 %v1674_v26  ;;  %v1395_v34 = vld [vmem:[%s2194_s7 + $0x1] ss:$0 sm:$0xff] }
 0x14f   : > { %1449 = vmatprep.subr.bf16.mxu1 %v1641_v35  ;;  %1530 = vmatprep.subr.bf16.mxu0 %v1866_v19 }
 0x152   : > { %1450 = vmatpush3.bf16.msra.mxu1 %v1642_v36 }
 0x153   : > { %1451 = vmatprep.subr.bf16.mxu1 %v1643_v37 }
 0x156   : > { %1452 = vmatpush3.bf16.msra.mxu1 %v1644_v38 }
 0x157   : > { %1453 = vmatprep.subr.bf16.mxu1 %v1645_v39 }
 0x15a   : > { %1454 = vmatpush3.bf16.msra.mxu1 %v1646_v40 }
 0x15b   : > { %1455 = vmatprep.subr.bf16.mxu1 %v1647_v41 }
 0x15e   : > { %1456 = vmatpush3.bf16.msra.mxu1 %v1648_v42 }
 0x15f   : > { %1457 = vmatprep.subr.bf16.mxu1 %v1649_v43 }
 0x162   : > { %1458 = vmatpush3.bf16.msra.mxu1 %v1650_v44 }
 0x163   : > { %1465 = vmatprep.subr.bf16.mxu1 %v1651_v45 }
 0x218   : > { %v586_v53 = vpop.f32.mrb[0].mxu1 }
 0x219   : > { %v587_v54 = vadd.f32 %v586_v53, %v531_v51  ;;  %v588_v55 = vpop.f32.mrb[1].mxu1 }
 0x21a   : > { %v589_v56 = vadd.f32 %v588_v55, %v535_v52  ;;  %v590_v57 = vpop.f32.mrb[2].mxu1  ;;  %v1679_v55 = vld [vmem:[#allocation5 + $0x20] sm:$0xff]  }
 0x21b   : > { %v591_v58 = vadd.f32 %v590_v57, %v531_v51  ;;  %v592_v59 = vpop.f32.mrb[3].mxu1  ;;  %v595_v61 = vmax.f32 %v587_v54, 0.0  ;;  %v1680_v57 = vld [vmem:[#allocation5 + $0x28] sm:$0xff]  }
 0x21c   : > { %v593_v60 = vadd.f32 %v592_v59, %v535_v52  ;;  %v596_v63 = vmax.f32 %v589_v56, 0.0  ;;  %v1678_v52 = vld [vmem:[#allocation5 + $0x18] sm:$0xff]  }
 0x21d   : > { %v597_v62 = vmax.f32 %v591_v58, 0.0  ;;  %v1681_v58 = vld [vmem:[#allocation5 + $0x30] sm:$0xff]   ;;  %v1682_v59 = vld [vmem:[#allocation5 + $0x38] sm:$0xff]  }
 0x21e   : > { %v598_v0 = vmax.f32 %v593_v60, 0.0 }
 0x21f   : > { %v599_v1 = vpack.c.bf16 %v597_v62, %v595_v61 }
 0x220   : > { %v600_v2 = vpack.c.bf16 %v598_v0, %v596_v63 }
 0x222   : > { %768 = vmatprep.mubr.bf16.mxu1 %v600_v2 }
 0x223   : > { %769 = vmatmul.mubr.bf16.vlgmr.msra.gmra.mrb[4].mxu1 %v599_v1 }
 0x224   : > { %1466 = vmatpush3.bf16.msra.mxu1 %v1652_v3  ;;  %967 = vmatprep.mubr.bf16.mxu1 %v600_v2 }
 0x225   : > { %1467 = vmatprep.subr.bf16.mxu1 %v1653_v4 }
 0x228   : > { %1468 = vmatpush3.bf16.msra.mxu1 %v1654_v5 }
 0x229   : > { %1469 = vmatprep.subr.bf16.mxu1 %v1655_v6 }
 0x22c   : > { %1470 = vmatpush3.bf16.msra.mxu1 %v1656_v7 }
 0x22d   : > { %1471 = vmatprep.subr.bf16.mxu1 %v1657_v8 }
 0x230   : > { %1472 = vmatpush3.bf16.msra.mxu1 %v1658_v9 }
 0x231   : > { %1473 = vmatprep.subr.bf16.mxu1 %v1659_v10 }
 0x234   : > { %1474 = vmatpush3.bf16.msra.mxu1 %v1660_v11 }
 0x235   : > { %1475 = vmatprep.subr.bf16.mxu1 %v1661_v12 }
 0x238   : > { %1476 = vmatpush3.bf16.msra.mxu1 %v1662_v13 }
 0x239   : > { %1477 = vmatprep.subr.bf16.mxu1 %v1663_v14 }
 0x23c   : > { %1478 = vmatpush3.bf16.msra.mxu1 %v1664_v15 }
 0x23d   : > { %1479 = vmatprep.subr.bf16.mxu1 %v1665_v16 }
 0x240   : > { %1480 = vmatpush3.bf16.msra.mxu1 %v1666_v17 }
 0x243   : > { %968 = vmatmul.mubr.bf16.vlgmr.msra.gmra.mrb[8].mxu1 %v599_v1 }
 0x2f6   : > { %v1459_v27 = vpop.f32.mrb[4].mxu1 }
 0x2f7   : > { %v1460_v28 = vpop.f32.mrb[5].mxu1 }
 0x2f8   : > { %v1461_v29 = vadd.f32 %v1460_v28, %v1459_v27  ;;  %v1462_v30 = vpop.f32.mrb[6].mxu1 }
 0x2f9   : > { %v1463_v31 = vpop.f32.mrb[7].mxu1 }
 0x2fa   : > { %v1464_v32 = vadd.f32 %v1463_v31, %v1462_v30  ;;  %v771_v53 = vadd.f32 %v1461_v29, %v1378_v50 }
 0x2fc   : > { %v774_v51 = vadd.f32 %v1464_v32, %v1378_v50  ;;  %v777_v56 = vmul.f32 1.442695, %v771_v53 }
 0x2fe   : > { %v779_v54 = vmul.f32 1.442695, %v774_v51 }
 0x316   : > { %v1481_v33 = vpop.f32.mrb[8].mxu1 }
 0x317   : > { %v1482_v35 = vpop.f32.mrb[9].mxu1 }
 0x318   : > { %v1483_v36 = vadd.f32 %v1482_v35, %v1481_v33  ;;  %v1484_v37 = vpop.f32.mrb[10].mxu1 }
 0x319   : > { %v1485_v38 = vpop.f32.mrb[11].mxu1 }
 0x31a   : > { %v970_v39 = vadd.f32 %v1483_v36, %v1395_v34  ;;  %v1486_v40 = vadd.f32 %v1485_v38, %v1484_v37 }
 0x31c   : > { %v976_v41 = vmul.f32 1.442695, %v970_v39  ;;  %v973_v42 = vadd.f32 %v1486_v40, %v1395_v34 }
 0x31e   : > { %v978_v43 = vmul.f32 1.442695, %v973_v42  ;;  %1687 = vpow2.f32 %v976_v41 }
 0x320   : > { %1689 = vpow2.f32 %v978_v43 }
 0x321   : > { %1691 = vpow2.f32 %v779_v54 }
 0x322   : > { %1693 = vpow2.f32 %v777_v56 }
 0x328   : > { %v1688_v44 = vpop.eup %1687 }
 0x32a   : > { %v2085_v45 = vpop.eup %1689 }
 0x32b   : > { %v980_v47 = vpack.c.bf16 %v2085_v45, %v1688_v44  ;;  %v1692_v60 = vpop.eup %1691 }
 0x32c   : > { %v1694_v61 = vpop.eup %1693 }
 0x32d   : > { %1527 = vmatmul.mubr.bf16.vlgmr.msra.gmra.mrb[4].mxu0 %v980_v47  ;;  %v781_v62 = vpack.c.bf16 %v1692_v60, %v1694_v61 }
 0x32e   : > { %1531 = vmatpush3.bf16.msra.mxu0 %v1675_v46  ;;  %1546 = vmatprep.mubr.msk.bf16.mxu0 %vm1867_vm2, %v1866_v19 }
 0x32f   : > { %1532 = vmatprep.subr.bf16.mxu0 %v1866_v19 }
 0x332   : > { %1533 = vmatpush3.bf16.msra.mxu0 %v1676_v48 }
 0x333   : > { %1534 = vmatprep.subr.bf16.mxu0 %v1866_v19 }
 0x336   : > { %1535 = vmatpush3.bf16.msra.mxu0 %v1677_v49 }
 0x337   : > { %1536 = vmatprep.subr.bf16.mxu0 %v1866_v19 }
 0x33a   : > { %1537 = vmatpush3.bf16.msra.mxu0 %v1678_v52 }
 0x33b   : > { %1538 = vmatprep.subr.bf16.mxu0 %v1866_v19 }
 0x33e   : > { %1539 = vmatpush3.bf16.msra.mxu0 %v1679_v55 }
 0x33f   : > { %1540 = vmatprep.subr.bf16.mxu0 %v1866_v19 }
 0x342   : > { %1541 = vmatpush3.bf16.msra.mxu0 %v1680_v57 }
 0x343   : > { %1542 = vmatprep.subr.bf16.mxu0 %v1866_v19 }
 0x346   : > { %1543 = vmatpush3.bf16.msra.mxu0 %v1681_v58 }
 0x347   : > { %1544 = vmatprep.subr.bf16.mxu0 %v1866_v19 }
 0x34a   : > { %1545 = vmatpush3.bf16.msra.mxu0 %v1682_v59 }
 0x34d   : > { %1547 = vmatmul.mubr.bf16.vlgmr.msra.gmra.mrb[4].mxu0 %v781_v62 }
 0x420   : > { %v1168_v63 = vpop.f32.mrb[4].mxu0 }
 0x421   : > { %1695 = vrcp.f32 %v1168_v63  ;;  %v1548_v0 = vpop.f32.mrb[5].mxu0 }
 0x422   : > { %v1171_v1 = vpop.f32.mrb[6].mxu0 }
 0x423   : > { %v1549_v2 = vpop.f32.mrb[7].mxu0  ;;  %1697 = vrcp.f32 %v1171_v1 }
 0x42b   : > { %v1696_v3 = vpop.eup %1695 }
 0x42c   : > { %1187 = vperm.xlu1 %1630, %v1696_v3  }
 0x42d   : > { %v1698_v4 = vpop.eup %1697 }
 0x430   : > { %1192 = vperm.xlu1 %1630, %v1698_v4  }
 0x4ab   : > { %v1188_v5 = vpop.permute.xlu1 %1187 }
 0x4ac   : > { %v1195_v6 = vmul.f32 %v1694_v61, %v1188_v5  ;;  %v1196_v7 = vmul.f32 %v1688_v44, %v1188_v5  ;;  %v1203_v8 = vmul.f32 %v1188_v5, %v1168_v63 }
 0x4ae   : > { %1199 = vst [vmem:[%s387_s19] sm:$0xff] %v1195_v6  ;;  %1200 = vst [vmem:[%s387_s19 + $0x8] sm:$0xff] %v1196_v7 }
 0x4af   : > { %1205 = vst [vmem:[%s394_s29] sm:$0xff] %v1203_v8  ;;  %v1193_v9 = vpop.permute.xlu1 %1192 }
 0x4b0   : > { %v1197_v10 = vmul.f32 %v1692_v60, %v1193_v9  ;;  %v1198_v11 = vmul.f32 %v2085_v45, %v1193_v9  ;;  %v1204_v12 = vmul.f32 %v1193_v9, %v1171_v1 }
 0x4b2   : > { %1201 = vst [vmem:[%s387_s19 + $0x10] sm:$0xff] %v1197_v10  ;;  %1202 = vst [vmem:[%s387_s19 + $0x18] sm:$0xff] %v1198_v11 }
 0x4b3   : > { %1206 = vst [vmem:[%s394_s29 + $0x8] sm:$0xff] %v1204_v12 }
 0x4b4   : > { %1768 = shalt.err (!%p1765_p11)
}
 0x4b5   : > { %s1769_s29 = scalar_lea.hbm %s2112_s25, 512  ;;  %s1773_s30 = scalar_lea.hbm %s2196_s9, 1536 }
 0x4b6   : > { %p1770_p13 = scmp.ne.s32.totalorder %s2112_s25, %s1769_s29  ;;  %p1774_p6 = scmp.lt.u32.totalorder %s2112_s25, %s2196_s9 }
 0x4b7   : > { %p1775_p9 = scmp.lt.u32.totalorder %s1773_s30, %s1769_s29  ;;  %p1777_p12 = scmp.lt.u32.totalorder %s1769_s29, %s2112_s25 }
 0x4b8   : > { %p1771_p0 = pnand %p1770_p13, %p2218_p1 }
 0x4b9   : > { %p1776_p10 = por %p1775_p9, %p1774_p6 }
 0x4ba   : > { %p1772_p5 = pneg %p1771_p0 }
 0x4bb   : > { %p1778_p2 = por %p1777_p12, %p1776_p10 }
 0x4bd   : > { %p1779_p3 = pnand %p1778_p2, %p1772_p5 }
 0x4bf   : > { %1782 = shalt.err (!%p1779_p3)
}
 0x4c0   : > { %s1869_s21 = smov 256   ;;  %s1870_s26 = smov 16  }
 0x4c1   : > { %1562 = dma.vmem_to_hbm [thread:$0]  (%p2218_p1), %s2114_s24, 512, %s2112_s25, %s1208_s18, %s1869_s21, %s1869_s21, %s1870_s26  }
 0x4c2   : > { %s1213_s15 = scalar_lea.sflag [#allocation9], %s2101_s20  ;;  %s1783_s28 = scalar_lea.vmem %s2106_s27, 256 }
 0x4c3   : > { %p1784_p4 = scmp.ne.s32.totalorder %s2106_s27, %s1783_s28  ;;  %s1871_s29 = smov [#allocation8]  }
 0x4c4   : > { %s1787_s19 = sshll.u32 %s1871_s29, 4  ;;  %s1788_s19 = int_to_ptr.vmem [resolvable:$false] %s1787_s19 }
 0x4c5   : > { %p1785_p7 = pnand %p1784_p4, %p2218_p1  ;;  %s1789_s11 = scalar_lea.vmem %s1788_s19, 512 }
 0x4c6   : > { %p1790_p11 = scmp.lt.s32.totalorder %s2106_s27, %s1788_s19  ;;  %p1791_p13 = scmp.lt.s32.totalorder %s1789_s11, %s1783_s28 }
 0x4c7   : > { %p1786_p8 = pneg %p1785_p7 }
 0x4c8   : > { %p1792_p0 = por %p1791_p13, %p1790_p11 }
 0x4ca   : > { %p1793_p5 = pnand %p1792_p0, %p1786_p8 }
 0x4cc   : > { %1796 = shalt.err (!%p1793_p5)
}
 0x4cd   : > { %s1797_s24 = scalar_lea.hbm %s2120_s22, 256  ;;  %s1801_s30 = scalar_lea.hbm %s2197_s10, 768 }
 0x4ce   : > { %p1798_p6 = scmp.ne.s32.totalorder %s2120_s22, %s1797_s24  ;;  %p1802_p12 = scmp.lt.u32.totalorder %s2120_s22, %s2197_s10 }
 0x4cf   : > { %p1803_p2 = scmp.lt.u32.totalorder %s1801_s30, %s1797_s24  ;;  %p1805_p4 = scmp.lt.u32.totalorder %s1797_s24, %s2120_s22 }
 0x4d0   : > { %p1799_p9 = pnand %p1798_p6, %p2218_p1 }
 0x4d1   : > { %p1804_p3 = por %p1803_p2, %p1802_p12 }
 0x4d2   : > { %p1800_p10 = pneg %p1799_p9 }
 0x4d3   : > { %p1806_p7 = por %p1805_p4, %p1804_p3 }
 0x4d5   : > { %p1807_p8 = pnand %p1806_p7, %p1800_p10 }
 0x4d7   : > { %1810 = shalt.err (!%p1807_p8)
}
 0x4d8   : > { %s1872_s21 = smov 128   ;;  %s1873_s26 = smov 8  }
 0x4d9   : > { %1563 = dma.vmem_to_hbm [thread:$0]  (%p2218_p1), %s2106_s27, 256, %s2120_s22, %s1213_s15, %s1872_s21, %s1872_s21, %s1873_s26  }
 0x4da PF: > { %s2219_s28 = sld [smem:[#allocation17_spill]]  ;;  %p1584_p11 = scmp.ge.s32.totalorder %s1857_s16, 2 }
 0x4db   : > { %s1258_s29 = sand.u32 1, %s1845_s13  }
 0x4dc   : > { %s1259_s19 = scalar_lea.sflag [#allocation4], %s1258_s29 }
 0x4e0   : > { %p2220_p13 = scmp.ne.s32.totalorder %s2219_s28, 0 }
 0x4e2   : > { %p1574_p0 = pnand %p1584_p11, %p2220_p13 }
 0x4e4   : > { %1836 = dma.done.wait (!%p1574_p0), %s1259_s19, 512  }
 0x4e5   : > { %1838 = vsyncadd (!%p1574_p0), %s1259_s19, 4294966784  ;;  %s1268_s11 = scalar_lea.sflag [#allocation9], %s1258_s29 }
 0x4e6   : > { %1840 = dma.done.wait (!%p1574_p0), %s1268_s11, 256  }
 0x4e7   : > { %1842 = vsyncadd (!%p1574_p0), %s1268_s11, 4294967040  ;;  %s2221_s16 = sld [smem:[#allocation15_spill]]  ;;  %s2222_s24 = sld [smem:[#allocation14_spill]] }
 0x4e8   : > { %s2223_s15 = sld [smem:[#allocation16_spill]]  ;;  %s2224_s13 = smov %s1849_s14 }
 0x4ed   : > { %p26_p1 = scmp.ge.s32.totalorder %s2221_s16, 5   ;;  %s2225_s14 = smov %s2222_s24 }
 0x4ef   :  { %28 = sbr.rel (!%p26_p1) target bundleno = 7 (0x7), region = 117 }
 0x4f6   :  { %1273 = vsyncpa [#allocation3], 1 }
 0x4f7   :  { %1275 = vsyncpa [#allocation3 + $0x1], 1 }
 0x4f8   :  { %1276 = vsyncpa [#allocation6], 1 }
 0x4f9   :  { %1277 = vsyncpa [#allocation4], 1 }
 0x4fa   :  { %1279 = vsyncpa [#allocation4 + $0x1], 1 }
 0x4fb   :  { %1280 = vsyncpa [#allocation9], 1 }
 0x4fc   :  { %1282 = vsyncpa [#allocation9 + $0x1], 1 }

</bundles_post_ra>
